<compile_context>
chip_gen: v6e
topology: v6e:2x2x1
jax: 0.10.0
libtpu: 0.0.40
codegen_flags: <defaults>
</compile_context>

<pallas_src>
import functools

import jax
import jax.numpy as jnp
from jax.experimental import pallas as pl
from jax.experimental.pallas import tpu as pltpu


# --------------------------------------------------------------------------
# kernel
# --------------------------------------------------------------------------
def _bottleneck_kernel(x_ref, w1_ref, b1_ref, wd_ref, bd_ref, w3_ref, b3_ref,
                       out_ref, pad_ref, *, stride, use_shortcut, h, w):
    TO = out_ref.shape[1]            # output rows per tile
    Wo = out_ref.shape[2]
    Cout_p = out_ref.shape[3]
    Cexp_p = pad_ref.shape[2]
    Wp = x_ref.shape[2]              # padded width (>= w + 2, multiple of 8)
    TIN = pad_ref.shape[0]           # TO * stride + 2 window rows (incl. halo)

    t = pl.program_id(1)
    row0 = pl.multiple_of(t * (TO * stride), TO * stride)   # window start row

    # ---- load the halo'd input row window (bf16, spatially pre-padded) ----
    x_win = x_ref[0, pl.ds(row0, TIN), :, :]                # (TIN, Wp, Cin_p)

    # ---- 1x1 expand conv (BN folded into weights) + ReLU on the MXU -------
    h1 = jnp.dot(x_win.reshape(TIN * Wp, x_win.shape[-1]), w1_ref[...],
                 preferred_element_type=jnp.float32)        # (TIN*Wp, Cexp_p)
    h1 = jnp.maximum(h1 + b1_ref[...], 0.0)

    # Stage the padded activation for the depthwise taps.  Only the spatial
    # padding positions need to be zeroed (thin slice stores); the rest of
    # the scratch is the single full h1 store we need anyway.
    pad_ref[...] = h1.reshape(TIN, Wp, Cexp_p)
    pad_ref[:, 0:1, :] = jnp.zeros((TIN, 1, Cexp_p), jnp.float32)
    pad_ref[:, w + 1:Wp, :] = jnp.zeros((TIN, Wp - w - 1, Cexp_p), jnp.float32)
    zrow = jnp.zeros((1, Wp, Cexp_p), jnp.float32)

    @pl.when(row0 == 0)                      # top image padding (first tile)
    def _():
        pad_ref[0:1, :, :] = zrow

    for i in (TIN - 2, TIN - 1):             # bottom image padding (last tile)
        @pl.when(row0 + i > h)
        def _(i=i):
            pad_ref[i:i + 1, :, :] = zrow

    # ---- 3x3 depthwise conv (stride, pad=1) + BN bias + ReLU on the VPU ---
    # NOTE: stride==2 still uses sublane-strided taps along W; an even/odd
    # column split would trade them for contiguous loads if this ever binds.
    acc = jnp.zeros((TO, Wo, Cexp_p), jnp.float32)
    for ky in range(3):
        for kx in range(3):
            if stride == 1:
                win = pad_ref[pl.ds(ky, TO), pl.ds(kx, Wo), :]
            else:
                win = pad_ref[pl.ds(ky, TO, stride), pl.ds(kx, Wo, stride), :]
            acc = acc + win * wd_ref[ky, kx, :]
    h2 = jnp.maximum(acc + bd_ref[...].reshape(1, 1, Cexp_p), 0.0)

    # ---- 1x1 linear pointwise conv (BN folded, no ReLU) on the MXU --------
    h3 = jnp.dot(h2.reshape(TO * Wo, Cexp_p).astype(jnp.bfloat16), w3_ref[...],
                 preferred_element_type=jnp.float32)
    h3 = (h3 + b3_ref[...]).reshape(TO, Wo, Cout_p)

    if use_shortcut:   # stride == 1 and Cin == Cout -> padded dims also match
        x_sc = x_ref[0, pl.ds(row0 + 1, TO), pl.ds(1, Wo), :]
        h3 = h3 + x_sc.astype(jnp.float32)

    out_ref[0] = h3.astype(out_ref.dtype)


# --------------------------------------------------------------------------
# wrapper
# --------------------------------------------------------------------------
def _round_up(v, m):
    return (v + m - 1) // m * m


def _pick_row_tile(ho, max_rows):
    t = min(ho, max_rows)
    while ho % t:
        t -= 1
    return t


@functools.partial(jax.jit,
                   static_argnames=("stride", "use_shortcut", "max_tile_rows"))
def bottleneck_forward(x_nchw, w1, s1, b1, wd, sd, bd, w3, s3, b3,
                       *, stride, use_shortcut, max_tile_rows=8):
    """x_nchw: (N, Cin, H, W) f32 -> (N, Cout, Ho, Wo) f32 (NCHW interface)."""
    x = jnp.transpose(x_nchw, (0, 2, 3, 1)).astype(jnp.float32)     # NHWC
    N, H, W, Cin = x.shape
    Cexp = w1.shape[1]
    Cout = w3.shape[1]
    Ho = (H + 2 - 3) // stride + 1
    Wo = (W + 2 - 3) // stride + 1

    LANE = 128
    Cin_p, Cexp_p, Cout_p = (_round_up(c, LANE) for c in (Cin, Cexp, Cout))

    # Fold BN scales into the conv weights (one-time weight transform in a real
    # deployment); pad every channel axis to the 128-lane width; bf16 for the
    # MXU matmul weights, f32 for the depthwise weights / biases.
    w1f = (w1 * s1[None, :]).astype(jnp.bfloat16)
    wdf = wd * sd[None, None, :]
    w3f = (w3 * s3[None, :]).astype(jnp.bfloat16)
    w1p = jnp.zeros((Cin_p, Cexp_p), jnp.bfloat16).at[:Cin, :Cexp].set(w1f)
    b1p = jnp.zeros((1, Cexp_p), jnp.float32).at[0, :Cexp].set(b1)
    wdp = jnp.zeros((3, 3, Cexp_p), jnp.float32).at[:, :, :Cexp].set(wdf)
    bdp = jnp.zeros((1, Cexp_p), jnp.float32).at[0, :Cexp].set(bd)
    w3p = jnp.zeros((Cexp_p, Cout_p), jnp.bfloat16).at[:Cexp, :Cout].set(w3f)
    b3p = jnp.zeros((1, Cout_p), jnp.float32).at[0, :Cout].set(b3)

    # Output-row tiling (bounds VMEM at real resolutions) + spatial pre-pad so
    # every tile's halo window is a static, in-bounds slice of the image block.
    TO = _pick_row_tile(Ho, max_tile_rows)
    n_tiles = Ho // TO
    TIN = TO * stride + 2
    Hp = Ho * stride + 2                      # >= H + 2
    Wp = _round_up(W + 2, 8)
    x_p = jnp.zeros((N, Hp, Wp, Cin_p), jnp.bfloat16)
    x_p = x_p.at[:, 1:H + 1, 1:W + 1, :Cin].set(x.astype(jnp.bfloat16))

    kernel = functools.partial(_bottleneck_kernel, stride=stride,
                               use_shortcut=use_shortcut, h=H, w=W)

    # Explicit VMEM budget: double-buffered x/out blocks + weights + scratch.
    est = (2 * Hp * Wp * Cin_p * 2
           + 2 * TO * Wo * Cout_p * 4
           + (Cin_p * Cexp_p + Cexp_p * Cout_p) * 2
           + (3 * 3 * Cexp_p + 3 * Cexp_p) * 4
           + TIN * Wp * Cexp_p * 4)
    vmem_limit = int(min(max(2 * est, 16 * 2 ** 20), 64 * 2 ** 20))

    out = pl.pallas_call(
        kernel,
        out_shape=jax.ShapeDtypeStruct((N, Ho, Wo, Cout_p), jnp.float32),
        grid=(N, n_tiles),
        in_specs=[
            pl.BlockSpec((1, Hp, Wp, Cin_p), lambda n, t: (n, 0, 0, 0)),
            pl.BlockSpec((Cin_p, Cexp_p), lambda n, t: (0, 0)),
            pl.BlockSpec((1, Cexp_p), lambda n, t: (0, 0)),
            pl.BlockSpec((3, 3, Cexp_p), lambda n, t: (0, 0, 0)),
            pl.BlockSpec((1, Cexp_p), lambda n, t: (0, 0)),
            pl.BlockSpec((Cexp_p, Cout_p), lambda n, t: (0, 0)),
            pl.BlockSpec((1, Cout_p), lambda n, t: (0, 0)),
        ],
        out_specs=pl.BlockSpec((1, TO, Wo, Cout_p), lambda n, t: (n, t, 0, 0)),
        scratch_shapes=[pltpu.VMEM((TIN, Wp, Cexp_p), jnp.float32)],
        compiler_params=pltpu.CompilerParams(
            dimension_semantics=("parallel", "parallel"),
            vmem_limit_bytes=vmem_limit),
    )(x_p, w1p, b1p, wdp, bdp, w3p, b3p)

    out = out[..., :Cout]                      # drop channel padding
    return jnp.transpose(out, (0, 3, 1, 2))    # back to NCHW


# --------------------------------------------------------------------------
# pure-JAX reference (mirrors the kernel's bf16 matmul inputs / f32 accum)
# --------------------------------------------------------------------------
def _reference_nhwc(x, p, *, stride, use_shortcut):
    Cexp = p["w1"].shape[1]
    w1f = (p["w1"] * p["s1"][None, :]).astype(jnp.bfloat16)
    wdf = p["wd"] * p["sd"][None, None, :]
    w3f = (p["w3"] * p["s3"][None, :]).astype(jnp.bfloat16)

    h = jnp.einsum("nhwc,cd->nhwd", x.astype(jnp.bfloat16), w1f,
                   preferred_element_type=jnp.float32)
    h = jnp.maximum(h + p["b1"][None, None, None, :], 0.0)

    dw = wdf.reshape(3, 3, 1, Cexp)
    h = jax.lax.conv_general_dilated(
        h, dw, window_strides=(stride, stride), padding=((1, 1), (1, 1)),
        dimension_numbers=("NHWC", "HWIO", "NHWC"), feature_group_count=Cexp)
    h = jnp.maximum(h + p["bd"][None, None, None, :], 0.0)

    h = jnp.einsum("nhwc,cd->nhwd", h.astype(jnp.bfloat16), w3f,
                   preferred_element_type=jnp.float32)
    h = h + p["b3"][None, None, None, :]
    if use_shortcut:
        h = h + x.astype(jnp.bfloat16).astype(jnp.float32)
    return h


def _make_params(key, Cin, Cout, expansion):
    Cexp = Cin * expansion
    ks = jax.random.split(key, 9)
    eps = 1e-5

    def nrm(k, shape, scale=0.1):
        return scale * jax.random.normal(k, shape, jnp.float32)

    def bn_fold(k, C, conv_bias):
        kg, kb, km, kv = jax.random.split(k, 4)
        gamma = 1.0 + 0.1 * jax.random.normal(kg, (C,), jnp.float32)
        beta = 0.1 * jax.random.normal(kb, (C,), jnp.float32)
        mean = 0.1 * jax.random.normal(km, (C,), jnp.float32)
        var = jnp.abs(jax.random.normal(kv, (C,), jnp.float32)) + 0.5
        s = gamma / jnp.sqrt(var + eps)
        b = (conv_bias - mean) * s + beta
        return s, b

    w1, cb1 = nrm(ks[0], (Cin, Cexp)), nrm(ks[1], (Cexp,))
    wd, cbd = nrm(ks[2], (3, 3, Cexp)), nrm(ks[3], (Cexp,))
    w3, cb3 = nrm(ks[4], (Cexp, Cout)), nrm(ks[5], (Cout,))
    s1, b1 = bn_fold(ks[6], Cexp, cb1)
    sd, bd = bn_fold(ks[7], Cexp, cbd)
    s3, b3 = bn_fold(ks[8], Cout, cb3)
    return dict(w1=w1, s1=s1, b1=b1, wd=wd, sd=sd, bd=bd, w3=w3, s3=s3, b3=b3)


def _run_case(key, N, Cin, Cout, H, W, expansion, stride):
    kx, kp = jax.random.split(key)
    use_shortcut = (stride == 1 and Cin == Cout)
    p = _make_params(kp, Cin, Cout, expansion)
    x = jax.random.normal(kx, (N, Cin, H, W), jnp.float32)

    y = bottleneck_forward(x, p["w1"], p["s1"], p["b1"],
                           p["wd"], p["sd"], p["bd"],
                           p["w3"], p["s3"], p["b3"],
                           stride=stride, use_shortcut=use_shortcut)
    y = jax.block_until_ready(y)

    ref = _reference_nhwc(jnp.transpose(x, (0, 2, 3, 1)), p,
                          stride=stride, use_shortcut=use_shortcut)
    ref = jnp.transpose(ref, (0, 3, 1, 2))

    Ho = (H + 2 - 3) // stride + 1
    Wo = (W + 2 - 3) // stride + 1
    assert y.shape == (N, Cout, Ho, Wo), y.shape
    err = jnp.max(jnp.abs(y - ref))
    assert jnp.allclose(y, ref, atol=2e-2, rtol=2e-2), f"max err {err}"


if __name__ == "__main__":
    key = jax.random.PRNGKey(0)
    k1, k2 = jax.random.split(key)

    # default module config: expansion=6, stride=2 (no shortcut)
    _run_case(k1, N=2, Cin=4, Cout=8, H=16, W=16, expansion=6, stride=2)
    # residual path: stride=1, in_channels == out_channels (shortcut + 2 row tiles)
    _run_case(k2, N=2, Cin=4, Cout=4, H=16, W=16, expansion=6, stride=1)

    print("KERNEL_OK")
</pallas_src>

<mosaic_0001>
module attributes {stable_mosaic.version = 11 : i64} {
  func.func @_bottleneck_kernel(%arg0: i32, %arg1: i32, %arg2: memref<1x18x24x128xbf16, #tpu.memory_space<vmem>>, %arg3: memref<128x128xbf16, #tpu.memory_space<vmem>>, %arg4: memref<1x128xf32, #tpu.memory_space<vmem>>, %arg5: memref<3x3x128xf32, #tpu.memory_space<vmem>>, %arg6: memref<1x128xf32, #tpu.memory_space<vmem>>, %arg7: memref<128x128xbf16, #tpu.memory_space<vmem>>, %arg8: memref<1x128xf32, #tpu.memory_space<vmem>>, %arg9: memref<1x8x8x128xf32, #tpu.memory_space<vmem>>, %arg10: memref<18x24x128xf32, #tpu.memory_space<vmem>>) attributes {dimension_semantics = [#tpu.dimension_semantics<parallel>, #tpu.dimension_semantics<parallel>], iteration_bounds = array<i64: 2, 1>, scalar_prefetch = 0 : i64, scratch_operands = 1 : i64, tpu.core_type = #tpu.core_type<tc>, window_params = [{transform_indices = @transform_0, window_bounds = array<i64: 1, 18, 24, 128>}, {pipeline_mode = #tpu.pipeline_mode<synchronous>, transform_indices = @transform_1, window_bounds = array<i64: 128, 128>}, {pipeline_mode = #tpu.pipeline_mode<synchronous>, transform_indices = @transform_2, window_bounds = array<i64: 1, 128>}, {pipeline_mode = #tpu.pipeline_mode<synchronous>, transform_indices = @transform_3, window_bounds = array<i64: 3, 3, 128>}, {pipeline_mode = #tpu.pipeline_mode<synchronous>, transform_indices = @transform_4, window_bounds = array<i64: 1, 128>}, {pipeline_mode = #tpu.pipeline_mode<synchronous>, transform_indices = @transform_5, window_bounds = array<i64: 128, 128>}, {pipeline_mode = #tpu.pipeline_mode<synchronous>, transform_indices = @transform_6, window_bounds = array<i64: 1, 128>}, {transform_indices = @transform_7, window_bounds = array<i64: 1, 8, 8, 128>}]} {
    %c16_i32 = arith.constant 16 : i32
    %0 = arith.muli %arg1, %c16_i32 : i32
    %1 = tpu.assume_multiple %0, 16 : i32
    %c0 = arith.constant 0 : index
    %2 = arith.index_cast %1 : i32 to index
    %c0_0 = arith.constant 0 : index
    %c0_1 = arith.constant 0 : index
    %3 = vector.load %arg2[%c0, %2, %c0_0, %c0_1] : memref<1x18x24x128xbf16, #tpu.memory_space<vmem>>, vector<1x18x24x128xbf16>
    %4 = vector.shape_cast %3 : vector<1x18x24x128xbf16> to vector<18x24x128xbf16>
    %5 = vector.shape_cast %4 : vector<18x24x128xbf16> to vector<432x128xbf16>
    %c0_2 = arith.constant 0 : index
    %c0_3 = arith.constant 0 : index
    %6 = vector.load %arg3[%c0_2, %c0_3] : memref<128x128xbf16, #tpu.memory_space<vmem>>, vector<128x128xbf16>
    %cst = arith.constant dense<0.000000e+00> : vector<432x128xf32>
    %7 = tpu.matmul %5, %6, %cst {dimension_numbers = #tpu.dot_dimension_numbers<[1], [0], [0], [1], [0, 0, 1, 1], [], []>} : vector<432x128xbf16>, vector<128x128xbf16>, vector<432x128xf32> -> vector<432x128xf32>
    %c0_4 = arith.constant 0 : index
    %c0_5 = arith.constant 0 : index
    %8 = vector.load %arg4[%c0_4, %c0_5] : memref<1x128xf32, #tpu.memory_space<vmem>>, vector<1x128xf32>
    %9 = vector.broadcast %8 : vector<1x128xf32> to vector<432x128xf32>
    %10 = arith.addf %7, %9 : vector<432x128xf32>
    %cst_6 = arith.constant 0.000000e+00 : f32
    %11 = vector.broadcast %cst_6 : f32 to vector<432x128xf32>
    %12 = arith.maximumf %10, %11 : vector<432x128xf32>
    %13 = vector.shape_cast %12 : vector<432x128xf32> to vector<18x24x128xf32>
    %c0_7 = arith.constant 0 : index
    %c0_8 = arith.constant 0 : index
    %c0_9 = arith.constant 0 : index
    %14 = vector.load %arg10[%c0_7, %c0_8, %c0_9] : memref<18x24x128xf32, #tpu.memory_space<vmem>>, vector<18x24x128xf32>
    tpu.vector_store %arg10[%c0_7, %c0_8, %c0_9], %13 {strides = array<i32>} : memref<18x24x128xf32, #tpu.memory_space<vmem>>, vector<18x24x128xf32>,
    %cst_10 = arith.constant 0.000000e+00 : f32
    %15 = vector.broadcast %cst_10 : f32 to vector<18x1x128xf32>
    %c0_11 = arith.constant 0 : index
    %c0_12 = arith.constant 0 : index
    %c0_13 = arith.constant 0 : index
    %16 = vector.load %arg10[%c0_11, %c0_12, %c0_13] : memref<18x24x128xf32, #tpu.memory_space<vmem>>, vector<18x1x128xf32>
    tpu.vector_store %arg10[%c0_11, %c0_12, %c0_13], %15 {strides = array<i32>} : memref<18x24x128xf32, #tpu.memory_space<vmem>>, vector<18x1x128xf32>,
    %cst_14 = arith.constant 0.000000e+00 : f32
    %17 = vector.broadcast %cst_14 : f32 to vector<18x7x128xf32>
    %c0_15 = arith.constant 0 : index
    %c17 = arith.constant 17 : index
    %c0_16 = arith.constant 0 : index
    %18 = vector.load %arg10[%c0_15, %c17, %c0_16] : memref<18x24x128xf32, #tpu.memory_space<vmem>>, vector<18x7x128xf32>
    tpu.vector_store %arg10[%c0_15, %c17, %c0_16], %17 {strides = array<i32>} : memref<18x24x128xf32, #tpu.memory_space<vmem>>, vector<18x7x128xf32>,
    %cst_17 = arith.constant 0.000000e+00 : f32
    %19 = vector.broadcast %cst_17 : f32 to vector<1x24x128xf32>
    %c0_i32 = arith.constant 0 : i32
    %20 = arith.cmpi eq, %1, %c0_i32 : i32
    %21 = arith.extui %20 : i1 to i32
    %c0_i32_18 = arith.constant 0 : i32
    %22 = arith.cmpi ne, %21, %c0_i32_18 : i32
    scf.if %22 {
      %c0_89 = arith.constant 0 : index
      %c0_90 = arith.constant 0 : index
      %c0_91 = arith.constant 0 : index
      %112 = vector.load %arg10[%c0_89, %c0_90, %c0_91] : memref<18x24x128xf32, #tpu.memory_space<vmem>>, vector<1x24x128xf32>
      tpu.vector_store %arg10[%c0_89, %c0_90, %c0_91], %19 {strides = array<i32>} : memref<18x24x128xf32, #tpu.memory_space<vmem>>, vector<1x24x128xf32>,
    } else {
    }
    %c16_i32_19 = arith.constant 16 : i32
    %23 = arith.addi %1, %c16_i32_19 : i32
    %c16_i32_20 = arith.constant 16 : i32
    %24 = arith.cmpi sgt, %23, %c16_i32_20 : i32
    %25 = arith.extui %24 : i1 to i32
    %c0_i32_21 = arith.constant 0 : i32
    %26 = arith.cmpi ne, %25, %c0_i32_21 : i32
    scf.if %26 {
      %c16 = arith.constant 16 : index
      %c0_89 = arith.constant 0 : index
      %c0_90 = arith.constant 0 : index
      %112 = vector.load %arg10[%c16, %c0_89, %c0_90] : memref<18x24x128xf32, #tpu.memory_space<vmem>>, vector<1x24x128xf32>
      tpu.vector_store %arg10[%c16, %c0_89, %c0_90], %19 {strides = array<i32>} : memref<18x24x128xf32, #tpu.memory_space<vmem>>, vector<1x24x128xf32>,
    } else {
    }
    %c17_i32 = arith.constant 17 : i32
    %27 = arith.addi %1, %c17_i32 : i32
    %c16_i32_22 = arith.constant 16 : i32
    %28 = arith.cmpi sgt, %27, %c16_i32_22 : i32
    %29 = arith.extui %28 : i1 to i32
    %c0_i32_23 = arith.constant 0 : i32
    %30 = arith.cmpi ne, %29, %c0_i32_23 : i32
    scf.if %30 {
      %c17_89 = arith.constant 17 : index
      %c0_90 = arith.constant 0 : index
      %c0_91 = arith.constant 0 : index
      %112 = vector.load %arg10[%c17_89, %c0_90, %c0_91] : memref<18x24x128xf32, #tpu.memory_space<vmem>>, vector<1x24x128xf32>
      tpu.vector_store %arg10[%c17_89, %c0_90, %c0_91], %19 {strides = array<i32>} : memref<18x24x128xf32, #tpu.memory_space<vmem>>, vector<1x24x128xf32>,
    } else {
    }
    %cst_24 = arith.constant 0.000000e+00 : f32
    %31 = vector.broadcast %cst_24 : f32 to vector<8x8x128xf32>
    %c0_25 = arith.constant 0 : index
    %c0_26 = arith.constant 0 : index
    %c0_27 = arith.constant 0 : index
    %32 = tpu.strided_load %arg10[%c0_25, %c0_26, %c0_27] {strides = array<i32: 2, 2, 1>} : memref<18x24x128xf32, #tpu.memory_space<vmem>>, vector<8x8x128xf32>
    %c0_28 = arith.constant 0 : index
    %c0_29 = arith.constant 0 : index
    %c0_30 = arith.constant 0 : index
    %33 = vector.load %arg5[%c0_28, %c0_29, %c0_30] : memref<3x3x128xf32, #tpu.memory_space<vmem>>, vector<1x1x128xf32>
    %34 = vector.shape_cast %33 : vector<1x1x128xf32> to vector<128xf32>
    %35 = vector.shape_cast %34 : vector<128xf32> to vector<1x1x128xf32>
    %36 = vector.broadcast %35 : vector<1x1x128xf32> to vector<8x8x128xf32>
    %37 = arith.mulf %32, %36 : vector<8x8x128xf32>
    %38 = arith.addf %31, %37 : vector<8x8x128xf32>
    %c0_31 = arith.constant 0 : index
    %c1 = arith.constant 1 : index
    %c0_32 = arith.constant 0 : index
    %39 = tpu.strided_load %arg10[%c0_31, %c1, %c0_32] {strides = array<i32: 2, 2, 1>} : memref<18x24x128xf32, #tpu.memory_space<vmem>>, vector<8x8x128xf32>
    %c0_33 = arith.constant 0 : index
    %c1_34 = arith.constant 1 : index
    %c0_35 = arith.constant 0 : index
    %40 = vector.load %arg5[%c0_33, %c1_34, %c0_35] : memref<3x3x128xf32, #tpu.memory_space<vmem>>, vector<1x1x128xf32>
    %41 = vector.shape_cast %40 : vector<1x1x128xf32> to vector<128xf32>
    %42 = vector.shape_cast %41 : vector<128xf32> to vector<1x1x128xf32>
    %43 = vector.broadcast %42 : vector<1x1x128xf32> to vector<8x8x128xf32>
    %44 = arith.mulf %39, %43 : vector<8x8x128xf32>
    %45 = arith.addf %38, %44 : vector<8x8x128xf32>
    %c0_36 = arith.constant 0 : index
    %c2 = arith.constant 2 : index
    %c0_37 = arith.constant 0 : index
    %46 = tpu.strided_load %arg10[%c0_36, %c2, %c0_37] {strides = array<i32: 2, 2, 1>} : memref<18x24x128xf32, #tpu.memory_space<vmem>>, vector<8x8x128xf32>
    %c0_38 = arith.constant 0 : index
    %c2_39 = arith.constant 2 : index
    %c0_40 = arith.constant 0 : index
    %47 = vector.load %arg5[%c0_38, %c2_39, %c0_40] : memref<3x3x128xf32, #tpu.memory_space<vmem>>, vector<1x1x128xf32>
    %48 = vector.shape_cast %47 : vector<1x1x128xf32> to vector<128xf32>
    %49 = vector.shape_cast %48 : vector<128xf32> to vector<1x1x128xf32>
    %50 = vector.broadcast %49 : vector<1x1x128xf32> to vector<8x8x128xf32>
    %51 = arith.mulf %46, %50 : vector<8x8x128xf32>
    %52 = arith.addf %45, %51 : vector<8x8x128xf32>
    %c1_41 = arith.constant 1 : index
    %c0_42 = arith.constant 0 : index
    %c0_43 = arith.constant 0 : index
    %53 = tpu.strided_load %arg10[%c1_41, %c0_42, %c0_43] {strides = array<i32: 2, 2, 1>} : memref<18x24x128xf32, #tpu.memory_space<vmem>>, vector<8x8x128xf32>
    %c1_44 = arith.constant 1 : index
    %c0_45 = arith.constant 0 : index
    %c0_46 = arith.constant 0 : index
    %54 = vector.load %arg5[%c1_44, %c0_45, %c0_46] : memref<3x3x128xf32, #tpu.memory_space<vmem>>, vector<1x1x128xf32>
    %55 = vector.shape_cast %54 : vector<1x1x128xf32> to vector<128xf32>
    %56 = vector.shape_cast %55 : vector<128xf32> to vector<1x1x128xf32>
    %57 = vector.broadcast %56 : vector<1x1x128xf32> to vector<8x8x128xf32>
    %58 = arith.mulf %53, %57 : vector<8x8x128xf32>
    %59 = arith.addf %52, %58 : vector<8x8x128xf32>
    %c1_47 = arith.constant 1 : index
    %c1_48 = arith.constant 1 : index
    %c0_49 = arith.constant 0 : index
    %60 = tpu.strided_load %arg10[%c1_47, %c1_48, %c0_49] {strides = array<i32: 2, 2, 1>} : memref<18x24x128xf32, #tpu.memory_space<vmem>>, vector<8x8x128xf32>
    %c1_50 = arith.constant 1 : index
    %c1_51 = arith.constant 1 : index
    %c0_52 = arith.constant 0 : index
    %61 = vector.load %arg5[%c1_50, %c1_51, %c0_52] : memref<3x3x128xf32, #tpu.memory_space<vmem>>, vector<1x1x128xf32>
    %62 = vector.shape_cast %61 : vector<1x1x128xf32> to vector<128xf32>
    %63 = vector.shape_cast %62 : vector<128xf32> to vector<1x1x128xf32>
    %64 = vector.broadcast %63 : vector<1x1x128xf32> to vector<8x8x128xf32>
    %65 = arith.mulf %60, %64 : vector<8x8x128xf32>
    %66 = arith.addf %59, %65 : vector<8x8x128xf32>
    %c1_53 = arith.constant 1 : index
    %c2_54 = arith.constant 2 : index
    %c0_55 = arith.constant 0 : index
    %67 = tpu.strided_load %arg10[%c1_53, %c2_54, %c0_55] {strides = array<i32: 2, 2, 1>} : memref<18x24x128xf32, #tpu.memory_space<vmem>>, vector<8x8x128xf32>
    %c1_56 = arith.constant 1 : index
    %c2_57 = arith.constant 2 : index
    %c0_58 = arith.constant 0 : index
    %68 = vector.load %arg5[%c1_56, %c2_57, %c0_58] : memref<3x3x128xf32, #tpu.memory_space<vmem>>, vector<1x1x128xf32>
    %69 = vector.shape_cast %68 : vector<1x1x128xf32> to vector<128xf32>
    %70 = vector.shape_cast %69 : vector<128xf32> to vector<1x1x128xf32>
    %71 = vector.broadcast %70 : vector<1x1x128xf32> to vector<8x8x128xf32>
    %72 = arith.mulf %67, %71 : vector<8x8x128xf32>
    %73 = arith.addf %66, %72 : vector<8x8x128xf32>
    %c2_59 = arith.constant 2 : index
    %c0_60 = arith.constant 0 : index
    %c0_61 = arith.constant 0 : index
    %74 = tpu.strided_load %arg10[%c2_59, %c0_60, %c0_61] {strides = array<i32: 2, 2, 1>} : memref<18x24x128xf32, #tpu.memory_space<vmem>>, vector<8x8x128xf32>
    %c2_62 = arith.constant 2 : index
    %c0_63 = arith.constant 0 : index
    %c0_64 = arith.constant 0 : index
    %75 = vector.load %arg5[%c2_62, %c0_63, %c0_64] : memref<3x3x128xf32, #tpu.memory_space<vmem>>, vector<1x1x128xf32>
    %76 = vector.shape_cast %75 : vector<1x1x128xf32> to vector<128xf32>
    %77 = vector.shape_cast %76 : vector<128xf32> to vector<1x1x128xf32>
    %78 = vector.broadcast %77 : vector<1x1x128xf32> to vector<8x8x128xf32>
    %79 = arith.mulf %74, %78 : vector<8x8x128xf32>
    %80 = arith.addf %73, %79 : vector<8x8x128xf32>
    %c2_65 = arith.constant 2 : index
    %c1_66 = arith.constant 1 : index
    %c0_67 = arith.constant 0 : index
    %81 = tpu.strided_load %arg10[%c2_65, %c1_66, %c0_67] {strides = array<i32: 2, 2, 1>} : memref<18x24x128xf32, #tpu.memory_space<vmem>>, vector<8x8x128xf32>
    %c2_68 = arith.constant 2 : index
    %c1_69 = arith.constant 1 : index
    %c0_70 = arith.constant 0 : index
    %82 = vector.load %arg5[%c2_68, %c1_69, %c0_70] : memref<3x3x128xf32, #tpu.memory_space<vmem>>, vector<1x1x128xf32>
    %83 = vector.shape_cast %82 : vector<1x1x128xf32> to vector<128xf32>
    %84 = vector.shape_cast %83 : vector<128xf32> to vector<1x1x128xf32>
    %85 = vector.broadcast %84 : vector<1x1x128xf32> to vector<8x8x128xf32>
    %86 = arith.mulf %81, %85 : vector<8x8x128xf32>
    %87 = arith.addf %80, %86 : vector<8x8x128xf32>
    %c2_71 = arith.constant 2 : index
    %c2_72 = arith.constant 2 : index
    %c0_73 = arith.constant 0 : index
    %88 = tpu.strided_load %arg10[%c2_71, %c2_72, %c0_73] {strides = array<i32: 2, 2, 1>} : memref<18x24x128xf32, #tpu.memory_space<vmem>>, vector<8x8x128xf32>
    %c2_74 = arith.constant 2 : index
    %c2_75 = arith.constant 2 : index
    %c0_76 = arith.constant 0 : index
    %89 = vector.load %arg5[%c2_74, %c2_75, %c0_76] : memref<3x3x128xf32, #tpu.memory_space<vmem>>, vector<1x1x128xf32>
    %90 = vector.shape_cast %89 : vector<1x1x128xf32> to vector<128xf32>
    %91 = vector.shape_cast %90 : vector<128xf32> to vector<1x1x128xf32>
    %92 = vector.broadcast %91 : vector<1x1x128xf32> to vector<8x8x128xf32>
    %93 = arith.mulf %88, %92 : vector<8x8x128xf32>
    %94 = arith.addf %87, %93 : vector<8x8x128xf32>
    %c0_77 = arith.constant 0 : index
    %c0_78 = arith.constant 0 : index
    %95 = vector.load %arg6[%c0_77, %c0_78] : memref<1x128xf32, #tpu.memory_space<vmem>>, vector<1x128xf32>
    %96 = vector.shape_cast %95 : vector<1x128xf32> to vector<1x1x128xf32>
    %97 = vector.broadcast %96 : vector<1x1x128xf32> to vector<8x8x128xf32>
    %98 = arith.addf %94, %97 : vector<8x8x128xf32>
    %cst_79 = arith.constant 0.000000e+00 : f32
    %99 = vector.broadcast %cst_79 : f32 to vector<8x8x128xf32>
    %100 = arith.maximumf %98, %99 : vector<8x8x128xf32>
    %101 = vector.shape_cast %100 : vector<8x8x128xf32> to vector<64x128xf32>
    %102 = arith.truncf %101 : vector<64x128xf32> to vector<64x128xbf16>
    %c0_80 = arith.constant 0 : index
    %c0_81 = arith.constant 0 : index
    %103 = vector.load %arg7[%c0_80, %c0_81] : memref<128x128xbf16, #tpu.memory_space<vmem>>, vector<128x128xbf16>
    %cst_82 = arith.constant dense<0.000000e+00> : vector<64x128xf32>
    %104 = tpu.matmul %102, %103, %cst_82 {dimension_numbers = #tpu.dot_dimension_numbers<[1], [0], [0], [1], [0, 0, 1, 1], [], []>} : vector<64x128xbf16>, vector<128x128xbf16>, vector<64x128xf32> -> vector<64x128xf32>
    %c0_83 = arith.constant 0 : index
    %c0_84 = arith.constant 0 : index
    %105 = vector.load %arg8[%c0_83, %c0_84] : memref<1x128xf32, #tpu.memory_space<vmem>>, vector<1x128xf32>
    %106 = vector.broadcast %105 : vector<1x128xf32> to vector<64x128xf32>
    %107 = arith.addf %104, %106 : vector<64x128xf32>
    %108 = vector.shape_cast %107 : vector<64x128xf32> to vector<8x8x128xf32>
    %c0_85 = arith.constant 0 : index
    %c0_86 = arith.constant 0 : index
    %c0_87 = arith.constant 0 : index
    %c0_88 = arith.constant 0 : index
    %109 = vector.load %arg9[%c0_85, %c0_86, %c0_87, %c0_88] : memref<1x8x8x128xf32, #tpu.memory_space<vmem>>, vector<1x8x8x128xf32>
    %110 = vector.shape_cast %109 : vector<1x8x8x128xf32> to vector<8x8x128xf32>
    %111 = vector.shape_cast %108 : vector<8x8x128xf32> to vector<1x8x8x128xf32>
    tpu.vector_store %arg9[%c0_85, %c0_86, %c0_87, %c0_88], %111 {strides = array<i32>} : memref<1x8x8x128xf32, #tpu.memory_space<vmem>>, vector<1x8x8x128xf32>,
    return
  }
  func.func @transform_0(%arg0: i32, %arg1: i32) -> (i32, i32, i32, i32) {
    %c0_i32 = arith.constant 0 : i32
    %c0_i32_0 = arith.constant 0 : i32
    %c0_i32_1 = arith.constant 0 : i32
    %c0_i32_2 = arith.constant 0 : i32
    return %arg0, %c0_i32, %c0_i32_0, %c0_i32_1 : i32, i32, i32, i32
  }
  func.func @transform_1(%arg0: i32, %arg1: i32) -> (i32, i32) {
    %c0_i32 = arith.constant 0 : i32
    %c0_i32_0 = arith.constant 0 : i32
    %c0_i32_1 = arith.constant 0 : i32
    return %c0_i32, %c0_i32_0 : i32, i32
  }
  func.func @transform_2(%arg0: i32, %arg1: i32) -> (i32, i32) {
    %c0_i32 = arith.constant 0 : i32
    %c0_i32_0 = arith.constant 0 : i32
    %c0_i32_1 = arith.constant 0 : i32
    return %c0_i32, %c0_i32_0 : i32, i32
  }
  func.func @transform_3(%arg0: i32, %arg1: i32) -> (i32, i32, i32) {
    %c0_i32 = arith.constant 0 : i32
    %c0_i32_0 = arith.constant 0 : i32
    %c0_i32_1 = arith.constant 0 : i32
    %c0_i32_2 = arith.constant 0 : i32
    return %c0_i32, %c0_i32_0, %c0_i32_1 : i32, i32, i32
  }
  func.func @transform_4(%arg0: i32, %arg1: i32) -> (i32, i32) {
    %c0_i32 = arith.constant 0 : i32
    %c0_i32_0 = arith.constant 0 : i32
    %c0_i32_1 = arith.constant 0 : i32
    return %c0_i32, %c0_i32_0 : i32, i32
  }
  func.func @transform_5(%arg0: i32, %arg1: i32) -> (i32, i32) {
    %c0_i32 = arith.constant 0 : i32
    %c0_i32_0 = arith.constant 0 : i32
    %c0_i32_1 = arith.constant 0 : i32
    return %c0_i32, %c0_i32_0 : i32, i32
  }
  func.func @transform_6(%arg0: i32, %arg1: i32) -> (i32, i32) {
    %c0_i32 = arith.constant 0 : i32
    %c0_i32_0 = arith.constant 0 : i32
    %c0_i32_1 = arith.constant 0 : i32
    return %c0_i32, %c0_i32_0 : i32, i32
  }
  func.func @transform_7(%arg0: i32, %arg1: i32) -> (i32, i32, i32, i32) {
    %c0_i32 = arith.constant 0 : i32
    %c0_i32_0 = arith.constant 0 : i32
    %c0_i32_1 = arith.constant 0 : i32
    return %arg0, %arg1, %c0_i32, %c0_i32_0 : i32, i32, i32, i32
  }
}

</mosaic_0001>

<bundles_post_ra>
// kernel: bottleneck_forward.1
= control target key start
LH: loop header
LB: loop body
LE: loop exit
PB: predicated region body
PF: predicated region fallthrough
CT: control target
= control target key end

     0   :  { %s2067_s24 = smov 0   ;;  %s2069_s25 = smov 0   ;;  %s2461_s0 = inlined_call_operand.vmem [shape: bf16[2,18,24,128], index: 0, kind: input, shape index: {}]   ;;  %s2462_s1 = inlined_call_operand.vmem [shape: bf16[128,128], index: 1, kind: input, shape index: {}]   ;;  %s2463_s2 = inlined_call_operand.vmem [shape: f32[1,128], index: 2, kind: input, shape index: {}]   ;;  %s2464_s3 = inlined_call_operand.vmem [shape: f32[3,3,128], index: 3, kind: input, shape index: {}]   ;;  %s2465_s4 = inlined_call_operand.vmem [shape: f32[1,128], index: 4, kind: input, shape index: {}]   ;;  %s2466_s5 = inlined_call_operand.vmem [shape: bf16[128,128], index: 5, kind: input, shape index: {}]   ;;  %s2467_s6 = inlined_call_operand.vmem [shape: f32[1,128], index: 6, kind: input, shape index: {}]   ;;  %s2468_s7 = inlined_call_operand.vmem [shape: f32[2,8,8,128], index: 7, kind: output, shape index: {}]  }
   0x1   :  { %s2071_s26 = smov 0  }
   0x2 LB: > { %s29_s27 = sadd.s32 1, %s2019_s25  ;;  %p1650_p0 = scmp.ge.s32.totalorder %s2023_s26, 1  ;;  %s2023_s26 = sphi %s2071_s26, %s17_s26   ;;  %s2019_s25 = sphi %s2069_s25, %s2470_s25   ;;  %s2015_s24 = sphi %s2067_s24, %s2469_s24  }
   0x3   : > { %p31_p1 = scmp.ge.s32.totalorder %s29_s27, 2  ;;  %p251_p2 = scmp.lt.s32.totalorder %s2023_s26, 3 }
   0x5   : > { %s2472_s27 = smov (%p31_p1, %s29_s27), 0  ;;  %p252_p3 = pnand %p1650_p0, %p251_p2 }
   0x6   : > { %p287_p4 = scmp.lt.s32.totalorder (!%p252_p3), %s2015_s24, 1 }
   0x7   : > { %255 = sbr.rel (%p252_p3) target bundleno = 585 (0x249), region = 48 }
   0xc   : > { %v1956_v0 = vld [vmem:[%s2462_s1 + $0x38] sm:$0xff]   ;;  %v2025_v1 = vmov 0.0   ;;  %v1957_v2 = vld [vmem:[%s2462_s1 + $0x30] sm:$0xff]   ;;  %vm2026_vm0 = vmmov 0   ;;  %s2474_s24 = smov (!%p287_p4, %s2015_s24), 1  ;;  %v1958_v3 = vld [vmem:[%s2462_s1 + $0x28] sm:$0xff]  }
   0xd   : > { %1765 = vmatprep.subr.bf16.mxu0 %v2025_v1  ;;  %1913 = vmatprep.subr.bf16.mxu1 %v2025_v1  ;;  %992 = vst [vmem:[#allocation2 + $0x8] sm:$0xff] %v2025_v1  ;;  %s1929_s11 = smul.u32 216, %s2474_s24  ;;  %v1959_v4 = vld [vmem:[%s2462_s1 + $0x20] sm:$0xff]   ;;  %v1960_v5 = vld [vmem:[%s2462_s1 + $0x18] sm:$0xff]   ;;  %v1961_v6 = vld [vmem:[%s2462_s1 + $0x10] sm:$0xff]   ;;  %s1717_s29 = sshll.u32 %s2474_s24, 6 }
   0xe   : > { %1766 = vmatpush3.bf16.msra.mxu0 %v1956_v0  ;;  %1921 = vmatpush3.bf16.msra.mxu1 %v1956_v0  ;;  %v1962_v7 = vld [vmem:[%s2462_s1 + $0x8] sm:$0xff]   ;;  %v1963_v8 = vld [vmem:[%s2462_s1] sm:$0xff]   ;;  %v1990_v35 = vld [vmem:[%s2466_s5 + $0x38] sm:$0xff]  }
   0xf   : > { %1767 = vmatprep.subr.bf16.mxu0 %v2025_v1  ;;  %1914 = vmatprep.subr.bf16.mxu1 %v2025_v1  ;;  %s2111_s14 = scalar_lea.vmem %s2461_s0, %s1929_s11  ;;  %v1991_v36 = vld [vmem:[%s2466_s5 + $0x30] sm:$0xff]   ;;  %v1992_v37 = vld [vmem:[%s2466_s5 + $0x28] sm:$0xff]   ;;  %v1993_v39 = vld [vmem:[%s2466_s5 + $0x20] sm:$0xff]   ;;  %s300_s11 = scalar_lea.vmem %s2468_s7, %s1717_s29 }
  0x10   : > { %1781 = vmatprep.mubr.msk.bf16.mxu0 %vm2026_vm0, %v2025_v1  ;;  %1841 = vmatprep.mubr.msk.bf16.mxu1 %vm2026_vm0, %v2025_v1  ;;  %v1964_v9 = vld [vmem:[%s2111_s14] sm:$0xff]   ;;  %v1965_v10 = vld [vmem:[%s2111_s14 + $0x78] sm:$0xff]   ;;  %v1966_v11 = vld [vmem:[%s2111_s14 + $0x8] sm:$0xff]  }
  0x11   : > { %v1967_v12 = vld [vmem:[%s2111_s14 + $0x80] sm:$0xff]   ;;  %v1968_v13 = vld [vmem:[%s2111_s14 + $0x10] sm:$0xff]   ;;  %v1969_v14 = vld [vmem:[%s2111_s14 + $0x88] sm:$0xff]  }
  0x12   : > { %1768 = vmatpush3.bf16.msra.mxu0 %v1957_v2  ;;  %1922 = vmatpush3.bf16.msra.mxu1 %v1957_v2  ;;  %v1970_v15 = vld [vmem:[%s2111_s14 + $0x18] sm:$0xff]   ;;  %v1971_v16 = vld [vmem:[%s2111_s14 + $0x90] sm:$0xff]   ;;  %v1972_v17 = vld [vmem:[%s2111_s14 + $0x20] sm:$0xff]  }
  0x13   : > { %1769 = vmatprep.subr.bf16.mxu0 %v2025_v1  ;;  %1915 = vmatprep.subr.bf16.mxu1 %v2025_v1  ;;  %v1973_v18 = vld [vmem:[%s2111_s14 + $0x98] sm:$0xff]   ;;  %v1974_v19 = vld [vmem:[%s2111_s14 + $0x28] sm:$0xff]   ;;  %v1975_v20 = vld [vmem:[%s2111_s14 + $0xa0] sm:$0xff]  }
  0x14   : > { %v1976_v21 = vld [vmem:[%s2111_s14 + $0x30] sm:$0xff]   ;;  %v1977_v22 = vld [vmem:[%s2111_s14 + $0xa8] sm:$0xff]   ;;  %v1978_v23 = vld [vmem:[%s2111_s14 + $0x38] sm:$0xff]  }
  0x15   : > { %v1979_v24 = vld [vmem:[%s2111_s14 + $0xb0] sm:$0xff]   ;;  %v1980_v25 = vld [vmem:[%s2111_s14 + $0x40] sm:$0xff]   ;;  %v1981_v26 = vld [vmem:[%s2111_s14 + $0xb8] sm:$0xff]  }
  0x16   : > { %1770 = vmatpush3.bf16.msra.mxu0 %v1958_v3  ;;  %1923 = vmatpush3.bf16.msra.mxu1 %v1958_v3  ;;  %v1982_v27 = vld [vmem:[%s2111_s14 + $0x48] sm:$0xff]   ;;  %v1983_v28 = vld [vmem:[%s2111_s14 + $0xc0] sm:$0xff]   ;;  %v1984_v29 = vld [vmem:[%s2111_s14 + $0x50] sm:$0xff]  }
  0x17   : > { %1771 = vmatprep.subr.bf16.mxu0 %v2025_v1  ;;  %1916 = vmatprep.subr.bf16.mxu1 %v2025_v1  ;;  %v1985_v30 = vld [vmem:[%s2111_s14 + $0xc8] sm:$0xff]   ;;  %v1986_v31 = vld [vmem:[%s2111_s14 + $0x58] sm:$0xff]   ;;  %v1987_v32 = vld [vmem:[%s2111_s14 + $0x60] sm:$0xff]  }
  0x18   : > { %v1988_v33 = vld [vmem:[%s2111_s14 + $0x68] sm:$0xff]   ;;  %v1989_v34 = vld [vmem:[%s2111_s14 + $0x70] sm:$0xff]   ;;  %v1995_v40 = vld [vmem:[%s2466_s5 + $0x18] sm:$0xff]  }
  0x19   : > { %v1994_v38 = vld [vmem:[%s2111_s14 + $0xd0] sm:$0xff]   ;;  %v1997_v42 = vld [vmem:[%s2466_s5 + $0x8] sm:$0xff]   ;;  %v1998_v43 = vld [vmem:[%s2466_s5] sm:$0xff]  }
  0x1a   : > { %1772 = vmatpush3.bf16.msra.mxu0 %v1959_v4  ;;  %1924 = vmatpush3.bf16.msra.mxu1 %v1959_v4  ;;  %v1996_v41 = vld [vmem:[%s2466_s5 + $0x10] sm:$0xff]   ;;  %v2242_v44 = vld [vmem:[%s2463_s2] ss:$0 sm:$0xff] }
  0x1b   : > { %1773 = vmatprep.subr.bf16.mxu0 %v2025_v1  ;;  %1917 = vmatprep.subr.bf16.mxu1 %v2025_v1 }
  0x1e   : > { %1774 = vmatpush3.bf16.msra.mxu0 %v1960_v5  ;;  %1925 = vmatpush3.bf16.msra.mxu1 %v1960_v5 }
  0x1f   : > { %1775 = vmatprep.subr.bf16.mxu0 %v2025_v1  ;;  %1918 = vmatprep.subr.bf16.mxu1 %v2025_v1 }
  0x22   : > { %1776 = vmatpush3.bf16.msra.mxu0 %v1961_v6  ;;  %1926 = vmatpush3.bf16.msra.mxu1 %v1961_v6 }
  0x23   : > { %1777 = vmatprep.subr.bf16.mxu0 %v2025_v1  ;;  %1919 = vmatprep.subr.bf16.mxu1 %v2025_v1 }
  0x26   : > { %1778 = vmatpush3.bf16.msra.mxu0 %v1962_v7  ;;  %1927 = vmatpush3.bf16.msra.mxu1 %v1962_v7 }
  0x27   : > { %1779 = vmatprep.subr.bf16.mxu0 %v2025_v1  ;;  %1920 = vmatprep.subr.bf16.mxu1 %v2025_v1 }
  0x2a   : > { %1780 = vmatpush3.bf16.msra.mxu0 %v1963_v8  ;;  %1928 = vmatpush3.bf16.msra.mxu1 %v1963_v8 }
  0x2b   : > { %1889 = vmatprep.subr.bf16.mxu1 %v1990_v35 }
  0x2d   : > { %1782 = vmatmul.mubr.bf16.vlgmr.msra.gmra.mxu0 %v1964_v9  ;;  %1842 = vmatmul.mubr.bf16.vlgmr.msra.gmra.mxu1 %v1965_v10 }
  0x2e   : > { %1785 = vmatprep.mubr.msk.bf16.mxu0 %vm2026_vm0, %v2025_v1  ;;  %1845 = vmatprep.mubr.msk.bf16.mxu1 %vm2026_vm0, %v2025_v1 }
  0x2f   : > { %1890 = vmatpush3.bf16.msra.mxu1 %v1990_v35 }
  0x30   : > { %1891 = vmatprep.subr.bf16.mxu1 %v1991_v36 }
  0x33   : > { %1892 = vmatpush3.bf16.msra.mxu1 %v1991_v36 }
  0x34   : > { %1893 = vmatprep.subr.bf16.mxu1 %v1992_v37 }
  0x35   : > { %1786 = vmatmul.mubr.bf16.gmra.mxu0 %v1966_v11  ;;  %1846 = vmatmul.mubr.bf16.gmra.mxu1 %v1967_v12 }
  0x36   : > { %1789 = vmatprep.mubr.msk.bf16.mxu0 %vm2026_vm0, %v2025_v1  ;;  %1849 = vmatprep.mubr.msk.bf16.mxu1 %vm2026_vm0, %v2025_v1 }
  0x37   : > { %1894 = vmatpush3.bf16.msra.mxu1 %v1992_v37 }
  0x38   : > { %1895 = vmatprep.subr.bf16.mxu1 %v1993_v39 }
  0x3b   : > { %1896 = vmatpush3.bf16.msra.mxu1 %v1993_v39 }
  0x3c   : > { %1897 = vmatprep.subr.bf16.mxu1 %v1995_v40 }
  0x3d   : > { %1790 = vmatmul.mubr.bf16.gmra.mxu0 %v1968_v13  ;;  %1850 = vmatmul.mubr.bf16.gmra.mxu1 %v1969_v14 }
  0x3e   : > { %1793 = vmatprep.mubr.msk.bf16.mxu0 %vm2026_vm0, %v2025_v1  ;;  %1853 = vmatprep.mubr.msk.bf16.mxu1 %vm2026_vm0, %v2025_v1 }
  0x3f   : > { %1898 = vmatpush3.bf16.msra.mxu1 %v1995_v40 }
  0x40   : > { %1899 = vmatprep.subr.bf16.mxu1 %v1996_v41 }
  0x43   : > { %1900 = vmatpush3.bf16.msra.mxu1 %v1996_v41 }
  0x44   : > { %1901 = vmatprep.subr.bf16.mxu1 %v1997_v42 }
  0x45   : > { %1794 = vmatmul.mubr.bf16.gmra.mxu0 %v1970_v15  ;;  %1854 = vmatmul.mubr.bf16.gmra.mxu1 %v1971_v16 }
  0x46   : > { %1797 = vmatprep.mubr.msk.bf16.mxu0 %vm2026_vm0, %v2025_v1  ;;  %1857 = vmatprep.mubr.msk.bf16.mxu1 %vm2026_vm0, %v2025_v1 }
  0x47   : > { %1902 = vmatpush3.bf16.msra.mxu1 %v1997_v42 }
  0x48   : > { %1903 = vmatprep.subr.bf16.mxu1 %v1998_v43 }
  0x4b   : > { %1904 = vmatpush3.bf16.msra.mxu1 %v1998_v43 }
  0x4d   : > { %1798 = vmatmul.mubr.bf16.gmra.mxu0 %v1972_v17  ;;  %1858 = vmatmul.mubr.bf16.gmra.mxu1 %v1973_v18 }
  0x4e   : > { %1801 = vmatprep.mubr.msk.bf16.mxu0 %vm2026_vm0, %v2025_v1  ;;  %1861 = vmatprep.mubr.msk.bf16.mxu1 %vm2026_vm0, %v2025_v1 }
  0x55   : > { %1802 = vmatmul.mubr.bf16.gmra.mxu0 %v1974_v19  ;;  %1862 = vmatmul.mubr.bf16.gmra.mxu1 %v1975_v20 }
  0x56   : > { %1805 = vmatprep.mubr.msk.bf16.mxu0 %vm2026_vm0, %v2025_v1  ;;  %1865 = vmatprep.mubr.msk.bf16.mxu1 %vm2026_vm0, %v2025_v1 }
  0x5d   : > { %1806 = vmatmul.mubr.bf16.gmra.mxu0 %v1976_v21  ;;  %1866 = vmatmul.mubr.bf16.gmra.mxu1 %v1977_v22 }
  0x5e   : > { %1809 = vmatprep.mubr.msk.bf16.mxu0 %vm2026_vm0, %v2025_v1  ;;  %1869 = vmatprep.mubr.msk.bf16.mxu1 %vm2026_vm0, %v2025_v1 }
  0x65   : > { %1810 = vmatmul.mubr.bf16.gmra.mxu0 %v1978_v23  ;;  %1870 = vmatmul.mubr.bf16.gmra.mxu1 %v1979_v24 }
  0x66   : > { %1813 = vmatprep.mubr.msk.bf16.mxu0 %vm2026_vm0, %v2025_v1  ;;  %1873 = vmatprep.mubr.msk.bf16.mxu1 %vm2026_vm0, %v2025_v1 }
  0x6d   : > { %1814 = vmatmul.mubr.bf16.gmra.mxu0 %v1980_v25  ;;  %1874 = vmatmul.mubr.bf16.gmra.mxu1 %v1981_v26 }
  0x6e   : > { %1817 = vmatprep.mubr.msk.bf16.mxu0 %vm2026_vm0, %v2025_v1  ;;  %1877 = vmatprep.mubr.msk.bf16.mxu1 %vm2026_vm0, %v2025_v1 }
  0x75   : > { %1818 = vmatmul.mubr.bf16.gmra.mxu0 %v1982_v27  ;;  %1878 = vmatmul.mubr.bf16.gmra.mxu1 %v1983_v28 }
  0x76   : > { %1821 = vmatprep.mubr.msk.bf16.mxu0 %vm2026_vm0, %v2025_v1  ;;  %1881 = vmatprep.mubr.msk.bf16.mxu1 %vm2026_vm0, %v2025_v1 }
  0x7d   : > { %1822 = vmatmul.mubr.bf16.gmra.mxu0 %v1984_v29  ;;  %1882 = vmatmul.mubr.bf16.gmra.mxu1 %v1985_v30 }
  0x7e   : > { %1825 = vmatprep.mubr.msk.bf16.mxu0 %vm2026_vm0, %v2025_v1  ;;  %1885 = vmatprep.mubr.msk.bf16.mxu1 %vm2026_vm0, %v2025_v1 }
  0x85   : > { %1826 = vmatmul.mubr.bf16.gmra.mxu0 %v1986_v31  ;;  %1886 = vmatmul.mubr.bf16.gmra.mxu1 %v1994_v38 }
  0x86   : > { %1829 = vmatprep.mubr.msk.bf16.mxu0 %vm2026_vm0, %v2025_v1 }
  0x8d   : > { %1830 = vmatmul.mubr.bf16.gmra.mxu0 %v1987_v32 }
  0x8e   : > { %1833 = vmatprep.mubr.msk.bf16.mxu0 %vm2026_vm0, %v2025_v1 }
  0x95   : > { %1834 = vmatmul.mubr.bf16.gmra.mxu0 %v1988_v33 }
  0x96   : > { %1837 = vmatprep.mubr.msk.bf16.mxu0 %vm2026_vm0, %v2025_v1 }
  0x9d   : > { %1838 = vmatmul.mubr.bf16.gmra.mxu0 %v1989_v34 }
  0xed   : > { %v628_v45 = vpop.f32.mrf.mxu0  ;;  %v748_v46 = vpop.f32.mrf.mxu1 }
  0xee   : > { %v629_v47 = vadd.f32 %v2242_v44, %v628_v45  ;;  %v749_v48 = vadd.f32 %v2242_v44, %v748_v46 }
  0xef   : > { %v1783_v49 = vpop.f32.mrf.mxu0  ;;  %v1843_v50 = vpop.f32.mrf.mxu1 }
  0xf0   : > { %v843_v51 = vmax.f32 %v629_v47, 0.0  ;;  %v873_v52 = vmax.f32 %v749_v48, 0.0  ;;  %v2270_v47 = vld [vmem:[%s2464_s3] ss:$0 sm:$0xff] }
  0xf1   : > { %v631_v53 = vpop.f32.mrf.mxu0  ;;  %v751_v54 = vpop.f32.mrf.mxu1 }
  0xf2   : > { %897 = vst [vmem:[#allocation2] sm:$0xff] %v843_v51  ;;  %927 = vst [vmem:[#allocation2 + $0xf0] sm:$0xff] %v873_v52  ;;  %v752_v55 = vadd.f32 %v2242_v44, %v751_v54  ;;  %v2277_v52 = vld [vmem:[%s2464_s3 + $0x1] ss:$0 sm:$0xff] }
  0xf3   : > { %951 = vst [vmem:[#allocation2] sm:$0x1] %v2025_v1  ;;  %961 = vst [vmem:[#allocation2 + $0xf0] sm:$0x1] %v2025_v1  ;;  %v1784_v56 = vpop.f32.mrf.mxu0  ;;  %v1844_v57 = vpop.f32.mrf.mxu1 }
  0xf4   : > { %991 = vst [vmem:[#allocation2] sm:$0xff] %v2025_v1  ;;  %v874_v58 = vmax.f32 %v752_v55, 0.0 }
  0xf5   : > { %v636_v59 = vpop.f32.mrf.mxu0  ;;  %v756_v60 = vpop.f32.mrf.mxu1 }
  0xf6   : > { %928 = vst [vmem:[#allocation2 + $0xf8] sm:$0xff] %v874_v58  ;;  %v637_v61 = vadd.f32 %v2242_v44, %v636_v59  ;;  %v757_v62 = vadd.f32 %v2242_v44, %v756_v60 }
  0xf7   : > { %v1787_v63 = vpop.f32.mrf.mxu0  ;;  %v1847_v0 = vpop.f32.mrf.mxu1 }
  0xf8   : > { %v845_v2 = vmax.f32 %v637_v61, 0.0  ;;  %v875_v3 = vmax.f32 %v757_v62, 0.0  ;;  %v2286_v0 = vld [vmem:[%s2464_s3 + $0x2] ss:$0 sm:$0xff] }
  0xf9   : > { %v639_v4 = vpop.f32.mrf.mxu0  ;;  %v759_v5 = vpop.f32.mrf.mxu1 }
  0xfa   : > { %899 = vst [vmem:[#allocation2 + $0x10] sm:$0xff] %v845_v2  ;;  %929 = vst [vmem:[#allocation2 + $0x100] sm:$0xff] %v875_v3  ;;  %v640_v6 = vadd.f32 %v2242_v44, %v639_v4  ;;  %v760_v7 = vadd.f32 %v2242_v44, %v759_v5 }
  0xfb   : > { %v1788_v8 = vpop.f32.mrf.mxu0  ;;  %v1848_v9 = vpop.f32.mrf.mxu1  ;;  %993 = vst [vmem:[#allocation2 + $0x10] sm:$0xff] %v2025_v1  ;;  %v1012_v50 = vld [vmem:[#allocation2] ss:$2 sm:$0xff]  ;;  %v1049_v51 = vld [vmem:[#allocation2 + $0x1] ss:$2 sm:$0xff] }
  0xfc   : > { %v846_v10 = vmax.f32 %v640_v6, 0.0  ;;  %v876_v11 = vmax.f32 %v760_v7, 0.0  ;;  %v1032_v59 = vmul.f32 %v2270_v47, %v1012_v50  ;;  %v1069_v60 = vmul.f32 %v2277_v52, %v1049_v51  ;;  %v2320_v51 = vld [vmem:[%s2464_s3 + $0x8] ss:$0 sm:$0xff] }
  0xfd   : > { %v644_v12 = vpop.f32.mrf.mxu0  ;;  %v764_v13 = vpop.f32.mrf.mxu1 }
  0xfe   : > { %900 = vst [vmem:[#allocation2 + $0x18] sm:$0xff] %v846_v10  ;;  %930 = vst [vmem:[#allocation2 + $0x108] sm:$0xff] %v876_v11  ;;  %v645_v14 = vadd.f32 %v2242_v44, %v644_v12  ;;  %v765_v15 = vadd.f32 %v2242_v44, %v764_v13  ;;  %v1077_v8 = vadd.f32 %v1069_v60, %v1032_v59  ;;  %v2294_v13 = vld [vmem:[%s2464_s3 + $0x4] ss:$0 sm:$0xff] }
  0xff   : > { %952 = vst [vmem:[#allocation2 + $0x18] sm:$0x1] %v2025_v1  ;;  %962 = vst [vmem:[#allocation2 + $0x108] sm:$0x1] %v2025_v1  ;;  %v1791_v16 = vpop.f32.mrf.mxu0  ;;  %v1851_v17 = vpop.f32.mrf.mxu1 }
 0x100   : > { %v847_v18 = vmax.f32 %v645_v14, 0.0  ;;  %v877_v19 = vmax.f32 %v765_v15, 0.0 }
 0x101   : > { %v647_v20 = vpop.f32.mrf.mxu0  ;;  %v767_v21 = vpop.f32.mrf.mxu1 }
 0x102   : > { %901 = vst [vmem:[#allocation2 + $0x20] sm:$0xff] %v847_v18  ;;  %931 = vst [vmem:[#allocation2 + $0x110] sm:$0xff] %v877_v19  ;;  %v648_v22 = vadd.f32 %v2242_v44, %v647_v20  ;;  %v768_v23 = vadd.f32 %v2242_v44, %v767_v21  ;;  %v1086_v63 = vld [vmem:[#allocation2 + $0x2] ss:$2 sm:$0xff] }
 0x103   : > { %v1792_v24 = vpop.f32.mrf.mxu0  ;;  %v1852_v25 = vpop.f32.mrf.mxu1  ;;  %v1106_v9 = vmul.f32 %v2286_v0, %v1086_v63 }
 0x104   : > { %v848_v26 = vmax.f32 %v648_v22, 0.0  ;;  %v878_v27 = vmax.f32 %v768_v23, 0.0 }
 0x105   : > { %v652_v28 = vpop.f32.mrf.mxu0  ;;  %v772_v29 = vpop.f32.mrf.mxu1  ;;  %v1114_v20 = vadd.f32 %v1106_v9, %v1077_v8 }
 0x106   : > { %902 = vst [vmem:[#allocation2 + $0x28] sm:$0xff] %v848_v26  ;;  %932 = vst [vmem:[#allocation2 + $0x118] sm:$0xff] %v878_v27  ;;  %v653_v30 = vadd.f32 %v2242_v44, %v652_v28  ;;  %v773_v31 = vadd.f32 %v2242_v44, %v772_v29 }
 0x107   : > { %v1795_v32 = vpop.f32.mrf.mxu0  ;;  %v1855_v33 = vpop.f32.mrf.mxu1 }
 0x108   : > { %v849_v34 = vmax.f32 %v653_v30, 0.0  ;;  %v879_v35 = vmax.f32 %v773_v31, 0.0  ;;  %v2304_v31 = vld [vmem:[%s2464_s3 + $0x5] ss:$0 sm:$0xff] }
 0x109   : > { %v655_v36 = vpop.f32.mrf.mxu0  ;;  %v775_v37 = vpop.f32.mrf.mxu1  ;;  %v1123_v12 = vld [vmem:[#allocation2 + $0x18] ss:$2 sm:$0xff]  ;;  %v1161_v30 = vld [vmem:[#allocation2 + $0x19] ss:$2 sm:$0xff] }
 0x10a   : > { %903 = vst [vmem:[#allocation2 + $0x30] sm:$0xff] %v849_v34  ;;  %933 = vst [vmem:[#allocation2 + $0x120] sm:$0xff] %v879_v35  ;;  %v656_v38 = vadd.f32 %v2242_v44, %v655_v36  ;;  %v776_v39 = vadd.f32 %v2242_v44, %v775_v37  ;;  %v1144_v21 = vmul.f32 %v2294_v13, %v1123_v12 }
 0x10b   : > { %953 = vst [vmem:[#allocation2 + $0x30] sm:$0x1] %v2025_v1  ;;  %963 = vst [vmem:[#allocation2 + $0x120] sm:$0x1] %v2025_v1  ;;  %v1796_v40 = vpop.f32.mrf.mxu0  ;;  %v1856_v41 = vpop.f32.mrf.mxu1 }
 0x10c   : > { %v850_v42 = vmax.f32 %v656_v38, 0.0  ;;  %v880_v43 = vmax.f32 %v776_v39, 0.0  ;;  %v1152_v35 = vadd.f32 %v1144_v21, %v1114_v20  ;;  %v2313_v41 = vld [vmem:[%s2464_s3 + $0x6] ss:$0 sm:$0xff] }
 0x10d   : > { %v660_v45 = vpop.f32.mrf.mxu0  ;;  %v780_v46 = vpop.f32.mrf.mxu1  ;;  %v1198_v40 = vld [vmem:[#allocation2 + $0x1a] ss:$2 sm:$0xff] }
 0x10e   : > { %904 = vst [vmem:[#allocation2 + $0x38] sm:$0xff] %v850_v42  ;;  %934 = vst [vmem:[#allocation2 + $0x128] sm:$0xff] %v880_v43  ;;  %v661_v48 = vadd.f32 %v2242_v44, %v660_v45  ;;  %v781_v49 = vadd.f32 %v2242_v44, %v780_v46  ;;  %v1181_v45 = vmul.f32 %v2304_v31, %v1161_v30 }
 0x10f   : > { %v1799_v53 = vpop.f32.mrf.mxu0  ;;  %v1859_v54 = vpop.f32.mrf.mxu1 }
 0x110   : > { %v851_v55 = vmax.f32 %v661_v48, 0.0  ;;  %v881_v56 = vmax.f32 %v781_v49, 0.0 }
 0x111   : > { %v663_v57 = vpop.f32.mrf.mxu0  ;;  %v783_v58 = vpop.f32.mrf.mxu1 }
 0x112   : > { %905 = vst [vmem:[#allocation2 + $0x40] sm:$0xff] %v851_v55  ;;  %935 = vst [vmem:[#allocation2 + $0x130] sm:$0xff] %v881_v56  ;;  %v664_v61 = vadd.f32 %v2242_v44, %v663_v57  ;;  %v784_v62 = vadd.f32 %v2242_v44, %v783_v58  ;;  %v1189_v56 = vadd.f32 %v1181_v45, %v1152_v35 }
 0x113   : > { %v1800_v2 = vpop.f32.mrf.mxu0  ;;  %v1860_v3 = vpop.f32.mrf.mxu1  ;;  %v1218_v57 = vmul.f32 %v2313_v41, %v1198_v40 }
 0x114   : > { %v852_v4 = vmax.f32 %v664_v61, 0.0  ;;  %v882_v5 = vmax.f32 %v784_v62, 0.0 }
 0x115   : > { %v668_v6 = vpop.f32.mrf.mxu0  ;;  %v788_v7 = vpop.f32.mrf.mxu1  ;;  %v1014_v26 = vld [vmem:[#allocation2 + $0x30] ss:$2 sm:$0xff]  ;;  %v1051_v27 = vld [vmem:[#allocation2 + $0x31] ss:$2 sm:$0xff]  ;;  %v1226_v9 = vadd.f32 %v1218_v57, %v1189_v56 }
 0x116   : > { %906 = vst [vmem:[#allocation2 + $0x48] sm:$0xff] %v852_v4  ;;  %936 = vst [vmem:[#allocation2 + $0x138] sm:$0xff] %v882_v5  ;;  %v669_v10 = vadd.f32 %v2242_v44, %v668_v6  ;;  %v789_v11 = vadd.f32 %v2242_v44, %v788_v7  ;;  %v1033_v38 = vmul.f32 %v2270_v47, %v1014_v26  ;;  %v1235_v50 = vld [vmem:[#allocation2 + $0x30] ss:$2 sm:$0xff] }
 0x117   : > { %954 = vst [vmem:[#allocation2 + $0x48] sm:$0x1] %v2025_v1  ;;  %964 = vst [vmem:[#allocation2 + $0x138] sm:$0x1] %v2025_v1  ;;  %v1803_v14 = vpop.f32.mrf.mxu0  ;;  %v1863_v15 = vpop.f32.mrf.mxu1  ;;  %v1070_v39 = vmul.f32 %v2277_v52, %v1051_v27  ;;  %v1256_v2 = vmul.f32 %v2320_v51, %v1235_v50 }
 0x118   : > { %v853_v16 = vmax.f32 %v669_v10, 0.0  ;;  %v883_v17 = vmax.f32 %v789_v11, 0.0  ;;  %v1273_v14 = vld [vmem:[#allocation2 + $0x31] ss:$2 sm:$0xff]  ;;  %v2334_v15 = vld [vmem:[%s2464_s3 + $0x9] ss:$0 sm:$0xff] }
 0x119   : > { %v671_v18 = vpop.f32.mrf.mxu0  ;;  %v791_v19 = vpop.f32.mrf.mxu1  ;;  %v1088_v34 = vld [vmem:[#allocation2 + $0x32] ss:$2 sm:$0xff]  ;;  %v1078_v60 = vadd.f32 %v1070_v39, %v1033_v38  ;;  %v1293_v27 = vmul.f32 %v2334_v15, %v1273_v14 }
 0x11a   : > { %907 = vst [vmem:[#allocation2 + $0x50] sm:$0xff] %v853_v16  ;;  %937 = vst [vmem:[#allocation2 + $0x140] sm:$0xff] %v883_v17  ;;  %v672_v22 = vadd.f32 %v2242_v44, %v671_v18  ;;  %v792_v23 = vadd.f32 %v2242_v44, %v791_v19  ;;  %v1107_v49 = vmul.f32 %v2286_v0, %v1088_v34 }
 0x11b   : > { %v1804_v24 = vpop.f32.mrf.mxu0  ;;  %v1864_v25 = vpop.f32.mrf.mxu1  ;;  %v1264_v19 = vadd.f32 %v1256_v2, %v1226_v9 }
 0x11c   : > { %v854_v28 = vmax.f32 %v672_v22, 0.0  ;;  %v884_v29 = vmax.f32 %v792_v23, 0.0  ;;  %v1115_v5 = vadd.f32 %v1107_v49, %v1078_v60  ;;  %v1310_v23 = vld [vmem:[#allocation2 + $0x32] ss:$2 sm:$0xff]  ;;  %v2340_v24 = vld [vmem:[%s2464_s3 + $0xa] ss:$0 sm:$0xff] }
 0x11d   : > { %v676_v32 = vpop.f32.mrf.mxu0  ;;  %v796_v33 = vpop.f32.mrf.mxu1  ;;  %v1301_v35 = vadd.f32 %v1293_v27, %v1264_v19 }
 0x11e   : > { %908 = vst [vmem:[#allocation2 + $0x58] sm:$0xff] %v854_v28  ;;  %938 = vst [vmem:[#allocation2 + $0x148] sm:$0xff] %v884_v29  ;;  %v677_v36 = vadd.f32 %v2242_v44, %v676_v32  ;;  %v797_v37 = vadd.f32 %v2242_v44, %v796_v33 }
 0x11f   : > { %v1807_v42 = vpop.f32.mrf.mxu0  ;;  %v1867_v43 = vpop.f32.mrf.mxu1 }
 0x120   : > { %v855_v46 = vmax.f32 %v677_v36, 0.0  ;;  %v885_v48 = vmax.f32 %v797_v37, 0.0  ;;  %v1330_v36 = vmul.f32 %v2340_v24, %v1310_v23 }
 0x121   : > { %v679_v53 = vpop.f32.mrf.mxu0  ;;  %v799_v54 = vpop.f32.mrf.mxu1  ;;  %v1125_v55 = vld [vmem:[#allocation2 + $0x48] ss:$2 sm:$0xff]  ;;  %v1163_v8 = vld [vmem:[#allocation2 + $0x49] ss:$2 sm:$0xff] }
 0x122   : > { %909 = vst [vmem:[#allocation2 + $0x60] sm:$0xff] %v855_v46  ;;  %939 = vst [vmem:[#allocation2 + $0x150] sm:$0xff] %v885_v48  ;;  %v680_v58 = vadd.f32 %v2242_v44, %v679_v53  ;;  %v800_v59 = vadd.f32 %v2242_v44, %v799_v54  ;;  %v1145_v61 = vmul.f32 %v2294_v13, %v1125_v55 }
 0x123   : > { %955 = vst [vmem:[#allocation2 + $0x60] sm:$0x1] %v2025_v1  ;;  %965 = vst [vmem:[#allocation2 + $0x150] sm:$0x1] %v2025_v1  ;;  %v1808_v62 = vpop.f32.mrf.mxu0  ;;  %v1868_v63 = vpop.f32.mrf.mxu1  ;;  %v1182_v22 = vmul.f32 %v2304_v31, %v1163_v8  ;;  %v1338_v54 = vadd.f32 %v1330_v36, %v1301_v35 }
 0x124   : > { %v856_v3 = vmax.f32 %v680_v58, 0.0  ;;  %v886_v4 = vmax.f32 %v800_v59, 0.0  ;;  %v1153_v12 = vadd.f32 %v1145_v61, %v1115_v5  ;;  %v2356_v62 = vld [vmem:[%s2465_s4] ss:$0 sm:$0xff] }
 0x125   : > { %v684_v6 = vpop.f32.mrf.mxu0  ;;  %v804_v7 = vpop.f32.mrf.mxu1  ;;  %v1200_v18 = vld [vmem:[#allocation2 + $0x4a] ss:$2 sm:$0xff]  ;;  %v1353_v9 = vadd.f32 %v2356_v62, %v1338_v54 }
 0x126   : > { %910 = vst [vmem:[#allocation2 + $0x68] sm:$0xff] %v856_v3  ;;  %940 = vst [vmem:[#allocation2 + $0x158] sm:$0xff] %v886_v4  ;;  %v685_v10 = vadd.f32 %v2242_v44, %v684_v6  ;;  %v805_v11 = vadd.f32 %v2242_v44, %v804_v7  ;;  %v1190_v30 = vadd.f32 %v1182_v22, %v1153_v12 }
 0x127   : > { %v1811_v16 = vpop.f32.mrf.mxu0  ;;  %v1871_v17 = vpop.f32.mrf.mxu1  ;;  %v1219_v32 = vmul.f32 %v2313_v41, %v1200_v18 }
 0x128   : > { %v857_v20 = vmax.f32 %v685_v10, 0.0  ;;  %v887_v21 = vmax.f32 %v805_v11, 0.0 }
 0x129   : > { %v687_v25 = vpop.f32.mrf.mxu0  ;;  %v807_v26 = vpop.f32.mrf.mxu1  ;;  %v1227_v48 = vadd.f32 %v1219_v32, %v1190_v30 }
 0x12a   : > { %911 = vst [vmem:[#allocation2 + $0x70] sm:$0xff] %v857_v20  ;;  %941 = vst [vmem:[#allocation2 + $0x160] sm:$0xff] %v887_v21  ;;  %v688_v28 = vadd.f32 %v2242_v44, %v687_v25  ;;  %v808_v29 = vadd.f32 %v2242_v44, %v807_v26  ;;  %v1361_v21 = vmax.f32 %v1353_v9, 0.0 }
 0x12b   : > { %v1812_v33 = vpop.f32.mrf.mxu0  ;;  %v1872_v34 = vpop.f32.mrf.mxu1 }
 0x12c   : > { %v858_v37 = vmax.f32 %v688_v28, 0.0  ;;  %v888_v38 = vmax.f32 %v808_v29, 0.0  ;;  %v2367_v29 = vld [vmem:[#allocation2 + $0x8] sm:$0xff] }
 0x12d   : > { %v692_v39 = vpop.f32.mrf.mxu0  ;;  %v812_v40 = vpop.f32.mrf.mxu1  ;;  %v1237_v42 = vld [vmem:[#allocation2 + $0x60] ss:$2 sm:$0xff]  ;;  %v1275_v43 = vld [vmem:[#allocation2 + $0x61] ss:$2 sm:$0xff] }
 0x12e   : > { %912 = vst [vmem:[#allocation2 + $0x78] sm:$0xff] %v858_v37  ;;  %942 = vst [vmem:[#allocation2 + $0x168] sm:$0xff] %v888_v38  ;;  %v693_v45 = vadd.f32 %v2242_v44, %v692_v39  ;;  %v813_v46 = vadd.f32 %v2242_v44, %v812_v40  ;;  %v1257_v49 = vmul.f32 %v2320_v51, %v1237_v42 }
 0x12f   : > { %956 = vst [vmem:[#allocation2 + $0x78] sm:$0x1] %v2025_v1  ;;  %966 = vst [vmem:[#allocation2 + $0x168] sm:$0x1] %v2025_v1  ;;  %v1815_v50 = vpop.f32.mrf.mxu0  ;;  %v1875_v53 = vpop.f32.mrf.mxu1  ;;  %v1294_v58 = vmul.f32 %v2334_v15, %v1275_v43 }
 0x130   : > { %v859_v55 = vmax.f32 %v693_v45, 0.0  ;;  %v889_v56 = vmax.f32 %v813_v46, 0.0  ;;  %v1265_v57 = vadd.f32 %v1257_v49, %v1227_v48  ;;  %v1016_v49 = vld [vmem:[#allocation2 + $0x60] ss:$2 sm:$0xff]  ;;  %v1053_v50 = vld [vmem:[#allocation2 + $0x61] ss:$2 sm:$0xff] }
 0x131   : > { %v695_v59 = vpop.f32.mrf.mxu0  ;;  %v815_v60 = vpop.f32.mrf.mxu1  ;;  %v1312_v61 = vld [vmem:[#allocation2 + $0x62] ss:$2 sm:$0xff] }
 0x132   : > { %913 = vst [vmem:[#allocation2 + $0x80] sm:$0xff] %v859_v55  ;;  %943 = vst [vmem:[#allocation2 + $0x170] sm:$0xff] %v889_v56  ;;  %v696_v1 = vadd.f32 %v2242_v44, %v695_v59  ;;  %v816_v63 = vadd.f32 %v2242_v44, %v815_v60  ;;  %v1302_v2 = vadd.f32 %v1294_v58, %v1265_v57  ;;  %v1090_v56 = vld [vmem:[#allocation2 + $0x62] ss:$2 sm:$0xff] }
 0x133   : > { %v1331_v3 = vmul.f32 %v2340_v24, %v1312_v61  ;;  %v1816_v4 = vpop.f32.mrf.mxu0  ;;  %v1876_v5 = vpop.f32.mrf.mxu1  ;;  %v1034_v58 = vmul.f32 %v2270_v47, %v1016_v49  ;;  %v1071_v59 = vmul.f32 %v2277_v52, %v1053_v50  ;;  %v1098_v50 = vld [vmem:[#allocation2 + $0x122] ss:$2 sm:$0xff] }
 0x134   : > { %v860_v6 = vmax.f32 %v696_v1, 0.0  ;;  %v890_v7 = vmax.f32 %v816_v63, 0.0  ;;  %v1108_v63 = vmul.f32 %v2286_v0, %v1090_v56  ;;  %v1100_v56 = vld [vmem:[#allocation2 + $0x152] ss:$2 sm:$0xff] }
 0x135   : > { %v1339_v8 = vadd.f32 %v1331_v3, %v1302_v2  ;;  %v700_v10 = vpop.f32.mrf.mxu0  ;;  %v820_v11 = vpop.f32.mrf.mxu1  ;;  %v1079_v4 = vadd.f32 %v1071_v59, %v1034_v58 }
 0x136   : > { %914 = vst [vmem:[#allocation2 + $0x88] sm:$0xff] %v860_v6  ;;  %944 = vst [vmem:[#allocation2 + $0x178] sm:$0xff] %v890_v7  ;;  %v701_v12 = vadd.f32 %v2242_v44, %v700_v10  ;;  %v821_v14 = vadd.f32 %v2242_v44, %v820_v11  ;;  %v1022_v11 = vld [vmem:[#allocation2 + $0xf0] ss:$2 sm:$0xff] }
 0x137   : > { %v1354_v16 = vadd.f32 %v2356_v62, %v1339_v8  ;;  %v1819_v17 = vpop.f32.mrf.mxu0  ;;  %v1879_v18 = vpop.f32.mrf.mxu1  ;;  %v1116_v10 = vadd.f32 %v1108_v63, %v1079_v4 }
 0x138   : > { %v861_v19 = vmax.f32 %v701_v12, 0.0  ;;  %v891_v20 = vmax.f32 %v821_v14, 0.0 }
 0x139   : > { %v1362_v22 = vmax.f32 %v1354_v16, 0.0  ;;  %v703_v23 = vpop.f32.mrf.mxu0  ;;  %v823_v25 = vpop.f32.mrf.mxu1  ;;  %v1127_v61 = vld [vmem:[#allocation2 + $0x78] ss:$2 sm:$0xff]  ;;  %v1165_v14 = vld [vmem:[#allocation2 + $0x79] ss:$2 sm:$0xff] }
 0x13a   : > { %915 = vst [vmem:[#allocation2 + $0x90] sm:$0xff] %v861_v19  ;;  %945 = vst [vmem:[#allocation2 + $0x180] sm:$0xff] %v891_v20  ;;  %v704_v26 = vadd.f32 %v2242_v44, %v703_v23  ;;  %v824_v27 = vadd.f32 %v2242_v44, %v823_v25  ;;  %v1146_v5 = vmul.f32 %v2294_v13, %v1127_v61  ;;  %v1059_v16 = vld [vmem:[#allocation2 + $0xf1] ss:$2 sm:$0xff]  ;;  %v1024_v20 = vld [vmem:[#allocation2 + $0x120] ss:$2 sm:$0xff] }
 0x13b   : > { %v1369_v28 = vpack.c.bf16 %v1362_v22, %v1361_v21  ;;  %957 = vst [vmem:[#allocation2 + $0x90] sm:$0x1] %v2367_v29  ;;  %967 = vst [vmem:[#allocation2 + $0x180] sm:$0x1] %v2367_v29  ;;  %v1820_v30 = vpop.f32.mrf.mxu0  ;;  %v1880_v32 = vpop.f32.mrf.mxu1  ;;  %v1061_v21 = vld [vmem:[#allocation2 + $0x121] ss:$2 sm:$0xff] }
 0x13c   : > { %v862_v33 = vmax.f32 %v704_v26, 0.0  ;;  %v892_v34 = vmax.f32 %v824_v27, 0.0  ;;  %v1154_v19 = vadd.f32 %v1146_v5, %v1116_v10  ;;  %v1026_v27 = vld [vmem:[#allocation2 + $0x150] ss:$2 sm:$0xff]  ;;  %v1183_v32 = vmul.f32 %v2304_v31, %v1165_v14 }
 0x13d   : > { %1905 = vmatprep.mubr.bf16.mxu1 %v1369_v28  ;;  %v708_v35 = vpop.f32.mrf.mxu0  ;;  %v828_v36 = vpop.f32.mrf.mxu1  ;;  %v1202_v26 = vld [vmem:[#allocation2 + $0x7a] ss:$2 sm:$0xff]  ;;  %v1063_v28 = vld [vmem:[#allocation2 + $0x151] ss:$2 sm:$0xff] }
 0x13e   : > { %916 = vst [vmem:[#allocation2 + $0x98] sm:$0xff] %v862_v33  ;;  %946 = vst [vmem:[#allocation2 + $0x188] sm:$0xff] %v892_v34  ;;  %v709_v37 = vadd.f32 %v2242_v44, %v708_v35  ;;  %v829_v38 = vadd.f32 %v2242_v44, %v828_v36  ;;  %v1037_v33 = vmul.f32 %v2270_v47, %v1022_v11  ;;  %v1137_v14 = vld [vmem:[#allocation2 + $0x168] ss:$2 sm:$0xff] }
 0x13f   : > { %v1823_v39 = vpop.f32.mrf.mxu0  ;;  %v1883_v40 = vpop.f32.mrf.mxu1  ;;  %v1074_v34 = vmul.f32 %v2277_v52, %v1059_v16  ;;  %v1076_v49 = vmul.f32 %v2277_v52, %v1063_v28  ;;  %v1171_v28 = vld [vmem:[#allocation2 + $0x109] ss:$2 sm:$0xff] }
 0x140   : > { %v863_v42 = vmax.f32 %v709_v37, 0.0  ;;  %v893_v43 = vmax.f32 %v829_v38, 0.0  ;;  %v1096_v38 = vld [vmem:[#allocation2 + $0xf2] ss:$2 sm:$0xff]  ;;  %v1038_v39 = vmul.f32 %v2270_v47, %v1024_v20  ;;  %v1075_v40 = vmul.f32 %v2277_v52, %v1061_v21 }
 0x141   : > { %v711_v45 = vpop.f32.mrf.mxu0  ;;  %v831_v46 = vpop.f32.mrf.mxu1  ;;  %v1082_v59 = vadd.f32 %v1074_v34, %v1037_v33  ;;  %v1151_v33 = vmul.f32 %v2294_v13, %v1137_v14 }
 0x142   : > { %917 = vst [vmem:[#allocation2 + $0xa0] sm:$0xff] %v863_v42  ;;  %947 = vst [vmem:[#allocation2 + $0x190] sm:$0xff] %v893_v43  ;;  %v712_v48 = vadd.f32 %v2242_v44, %v711_v45  ;;  %v1191_v45 = vadd.f32 %v1183_v32, %v1154_v19  ;;  %v1220_v46 = vmul.f32 %v2313_v41, %v1202_v26 }
 0x143   : > { %v1824_v53 = vpop.f32.mrf.mxu0  ;;  %v1884_v54 = vpop.f32.mrf.mxu1  ;;  %v1083_v63 = vadd.f32 %v1075_v40, %v1038_v39 }
 0x144   : > { %v864_v55 = vmax.f32 %v712_v48, 0.0  ;;  %v1039_v48 = vmul.f32 %v2270_v47, %v1026_v27  ;;  %v1228_v5 = vadd.f32 %v1220_v46, %v1191_v45  ;;  %v1186_v46 = vmul.f32 %v2304_v31, %v1171_v28 }
 0x145   : > { %v716_v57 = vpop.f32.mrf.mxu0  ;;  %v1018_v8 = vld [vmem:[#allocation2 + $0x90] ss:$2 sm:$0xff]  ;;  %v1055_v9 = vld [vmem:[#allocation2 + $0x91] ss:$2 sm:$0xff] }
 0x146   : > { %918 = vst [vmem:[#allocation2 + $0xa8] sm:$0xff] %v864_v55  ;;  %v717_v60 = vadd.f32 %v2242_v44, %v716_v57  ;;  %v1035_v23 = vmul.f32 %v2270_v47, %v1018_v8  ;;  %v1072_v25 = vmul.f32 %v2277_v52, %v1055_v9  ;;  %v1239_v37 = vld [vmem:[#allocation2 + $0x90] ss:$2 sm:$0xff]  ;;  %v1113_v8 = vmul.f32 %v2286_v0, %v1100_v56  ;;  %v1277_v11 = vld [vmem:[#allocation2 + $0x91] ss:$2 sm:$0xff] }
 0x147   : > { %958 = vst [vmem:[#allocation2 + $0xa8] sm:$0x1] %v2367_v29  ;;  %v1827_v1 = vpop.f32.mrf.mxu0  ;;  %v1258_v58 = vmul.f32 %v2320_v51, %v1239_v37  ;;  %v1295_v27 = vmul.f32 %v2334_v15, %v1277_v11  ;;  %v1173_v37 = vld [vmem:[#allocation2 + $0x139] ss:$2 sm:$0xff] }
 0x148   : > { %v865_v2 = vmax.f32 %v717_v60, 0.0  ;;  %v1080_v54 = vadd.f32 %v1072_v25, %v1035_v23  ;;  %v1111_v60 = vmul.f32 %v2286_v0, %v1096_v38  ;;  %v1175_v38 = vld [vmem:[#allocation2 + $0x169] ss:$2 sm:$0xff] }
 0x149   : > { %v719_v3 = vpop.f32.mrf.mxu0  ;;  %v1092_v18 = vld [vmem:[#allocation2 + $0x92] ss:$2 sm:$0xff]  ;;  %v1188_v56 = vmul.f32 %v2304_v31, %v1175_v38 }
 0x14a   : > { %919 = vst [vmem:[#allocation2 + $0xb0] sm:$0xff] %v865_v2  ;;  %v720_v6 = vadd.f32 %v2242_v44, %v719_v3  ;;  %v1109_v36 = vmul.f32 %v2286_v0, %v1092_v18  ;;  %v1112_v2 = vmul.f32 %v2286_v0, %v1098_v50  ;;  %v1266_v18 = vadd.f32 %v1258_v58, %v1228_v5 }
 0x14b   : > { %v1828_v7 = vpop.f32.mrf.mxu0  ;;  %v1119_v19 = vadd.f32 %v1111_v60, %v1082_v59  ;;  %v1210_v60 = vld [vmem:[#allocation2 + $0x13a] ss:$2 sm:$0xff] }
 0x14c   : > { %v866_v12 = vmax.f32 %v720_v6, 0.0  ;;  %v1117_v1 = vadd.f32 %v1109_v36, %v1080_v54  ;;  %v1133_v6 = vld [vmem:[#allocation2 + $0x108] ss:$2 sm:$0xff]  ;;  %v1084_v7 = vadd.f32 %v1076_v49, %v1039_v48  ;;  %v1120_v25 = vadd.f32 %v1112_v2, %v1083_v63 }
 0x14d   : > { %v724_v17 = vpop.f32.mrf.mxu0  ;;  %v1149_v23 = vmul.f32 %v2294_v13, %v1133_v6  ;;  %v1303_v40 = vadd.f32 %v1295_v27, %v1266_v18  ;;  %v1208_v2 = vld [vmem:[#allocation2 + $0x10a] ss:$2 sm:$0xff]  ;;  %v1224_v14 = vmul.f32 %v2313_v41, %v1210_v60 }
 0x14e   : > { %920 = vst [vmem:[#allocation2 + $0xb8] sm:$0xff] %v866_v12  ;;  %v725_v22 = vadd.f32 %v2242_v44, %v724_v17  ;;  %v1135_v12 = vld [vmem:[#allocation2 + $0x138] ss:$2 sm:$0xff] }
 0x14f   : > { %v1831_v30 = vpop.f32.mrf.mxu0  ;;  %v1150_v32 = vmul.f32 %v2294_v13, %v1135_v12  ;;  %v1157_v45 = vadd.f32 %v1149_v23, %v1119_v19  ;;  %v1223_v19 = vmul.f32 %v2313_v41, %v1208_v2  ;;  %v1324_v60 = vld [vmem:[#allocation2 + $0x182] ss:$2 sm:$0xff] }
 0x150   : > { %v867_v35 = vmax.f32 %v725_v22, 0.0  ;;  %v1314_v22 = vld [vmem:[#allocation2 + $0x92] ss:$2 sm:$0xff]  ;;  %v1121_v30 = vadd.f32 %v1113_v8, %v1084_v7 }
 0x151   : > { %v727_v42 = vpop.f32.mrf.mxu0  ;;  %v1129_v43 = vld [vmem:[#allocation2 + $0xa8] ss:$2 sm:$0xff]  ;;  %v1167_v4 = vld [vmem:[#allocation2 + $0xa9] ss:$2 sm:$0xff]  ;;  %v1194_v6 = vadd.f32 %v1186_v46, %v1157_v45 }
 0x152   : > { %921 = vst [vmem:[#allocation2 + $0xc0] sm:$0xff] %v867_v35  ;;  %v728_v53 = vadd.f32 %v2242_v44, %v727_v42  ;;  %v1147_v55 = vmul.f32 %v2294_v13, %v1129_v43  ;;  %v1184_v21 = vmul.f32 %v2304_v31, %v1167_v4  ;;  %v1332_v42 = vmul.f32 %v2340_v24, %v1314_v22 }
 0x153   : > { %959 = vst [vmem:[#allocation2 + $0xc0] sm:$0x1] %v2367_v29  ;;  %v1832_v57 = vpop.f32.mrf.mxu0  ;;  %v1159_v54 = vadd.f32 %v1151_v33, %v1121_v30  ;;  %v1283_v33 = vld [vmem:[#allocation2 + $0x121] ss:$2 sm:$0xff] }
 0x154   : > { %v868_v61 = vmax.f32 %v728_v53, 0.0  ;;  %v1155_v10 = vadd.f32 %v1147_v55, %v1117_v1  ;;  %v1158_v53 = vadd.f32 %v1150_v32, %v1120_v25  ;;  %v1187_v55 = vmul.f32 %v2304_v31, %v1173_v37 }
 0x155   : > { %v732_v3 = vpop.f32.mrf.mxu0  ;;  %v1204_v17 = vld [vmem:[#allocation2 + $0xaa] ss:$2 sm:$0xff]  ;;  %v1340_v63 = vadd.f32 %v1332_v42, %v1303_v40  ;;  %v1196_v12 = vadd.f32 %v1188_v56, %v1159_v54  ;;  %v1285_v42 = vld [vmem:[#allocation2 + $0x151] ss:$2 sm:$0xff]  ;;  %v1298_v46 = vmul.f32 %v2334_v15, %v1283_v33 }
 0x156   : > { %922 = vst [vmem:[#allocation2 + $0xc8] sm:$0xff] %v868_v61  ;;  %v733_v9 = vadd.f32 %v2242_v44, %v732_v3  ;;  %v1192_v35 = vadd.f32 %v1184_v21, %v1155_v10  ;;  %v1221_v36 = vmul.f32 %v2313_v41, %v1204_v17  ;;  %v1212_v61 = vld [vmem:[#allocation2 + $0x16a] ss:$2 sm:$0xff]  ;;  %v1195_v11 = vadd.f32 %v1187_v55, %v1158_v53 }
 0x157   : > { %v1835_v16 = vpop.f32.mrf.mxu0  ;;  %v1249_v21 = vld [vmem:[#allocation2 + $0x180] ss:$2 sm:$0xff]  ;;  %v1355_v23 = vadd.f32 %v2356_v62, %v1340_v63  ;;  %v1299_v54 = vmul.f32 %v2334_v15, %v1285_v42 }
 0x158   : > { %v869_v20 = vmax.f32 %v733_v9, 0.0  ;;  %v1229_v58 = vadd.f32 %v1221_v36, %v1192_v35  ;;  %v1225_v16 = vmul.f32 %v2313_v41, %v1212_v61  ;;  %v1263_v36 = vmul.f32 %v2320_v51, %v1249_v21  ;;  %v1320_v61 = vld [vmem:[#allocation2 + $0x122] ss:$2 sm:$0xff] }
 0x159   : > { %v735_v26 = vpop.f32.mrf.mxu0 }
 0x15a   : > { %923 = vst [vmem:[#allocation2 + $0xd0] sm:$0xff] %v869_v20  ;;  %v736_v34 = vadd.f32 %v2242_v44, %v735_v26  ;;  %v1247_v20 = vld [vmem:[#allocation2 + $0x150] ss:$2 sm:$0xff]  ;;  %v1245_v26 = vld [vmem:[#allocation2 + $0x120] ss:$2 sm:$0xff] }
 0x15b   : > { %v1836_v39 = vpop.f32.mrf.mxu0  ;;  %v1262_v35 = vmul.f32 %v2320_v51, %v1247_v20  ;;  %v1261_v40 = vmul.f32 %v2320_v51, %v1245_v26 }
 0x15c   : > { %v870_v43 = vmax.f32 %v736_v34, 0.0  ;;  %v1233_v34 = vadd.f32 %v1225_v16, %v1196_v12  ;;  %v1231_v39 = vadd.f32 %v1223_v19, %v1194_v6  ;;  %v1318_v16 = vld [vmem:[#allocation2 + $0xf2] ss:$2 sm:$0xff] }
 0x15d   : > { %v740_v48 = vpop.f32.mrf.mxu0  ;;  %v1241_v49 = vld [vmem:[#allocation2 + $0xc0] ss:$2 sm:$0xff]  ;;  %v1279_v50 = vld [vmem:[#allocation2 + $0xc1] ss:$2 sm:$0xff]  ;;  %v1334_v21 = vmul.f32 %v2340_v24, %v1318_v16 }
 0x15e   : > { %924 = vst [vmem:[#allocation2 + $0xd8] sm:$0xff] %v870_v43  ;;  %v741_v57 = vadd.f32 %v2242_v44, %v740_v48  ;;  %v1259_v59 = vmul.f32 %v2320_v51, %v1241_v49  ;;  %v1296_v5 = vmul.f32 %v2334_v15, %v1279_v50  ;;  %v1020_v9 = vld [vmem:[#allocation2 + $0xc0] ss:$2 sm:$0xff]  ;;  %v1057_v10 = vld [vmem:[#allocation2 + $0xc1] ss:$2 sm:$0xff]  ;;  %v1271_v53 = vadd.f32 %v1263_v36, %v1233_v34 }
 0x15f   : > { %960 = vst [vmem:[#allocation2 + $0xd8] sm:$0x1] %v2367_v29  ;;  %v1839_v1 = vpop.f32.mrf.mxu0  ;;  %v1036_v30 = vmul.f32 %v2270_v47, %v1020_v9  ;;  %v1073_v32 = vmul.f32 %v2277_v52, %v1057_v10  ;;  %v1287_v43 = vld [vmem:[#allocation2 + $0x181] ss:$2 sm:$0xff]  ;;  %v1363_v47 = vmax.f32 %v1355_v23, 0.0  ;;  %v1335_v10 = vmul.f32 %v2340_v24, %v1320_v61 }
 0x160   : > { %v871_v3 = vmax.f32 %v741_v57, 0.0  ;;  %v1267_v4 = vadd.f32 %v1259_v59, %v1229_v58  ;;  %v1300_v55 = vmul.f32 %v2334_v15, %v1287_v43  ;;  %v1269_v58 = vadd.f32 %v1261_v40, %v1231_v39  ;;  %v1322_v59 = vld [vmem:[#allocation2 + $0x152] ss:$2 sm:$0xff] }
 0x161   : > { %v743_v7 = vpop.f32.mrf.mxu0  ;;  %v1316_v8 = vld [vmem:[#allocation2 + $0xc2] ss:$2 sm:$0xff]  ;;  %v1081_v52 = vadd.f32 %v1073_v32, %v1036_v30  ;;  %v1336_v6 = vmul.f32 %v2340_v24, %v1322_v59  ;;  %v836_v32 = vpop.f32.mrf.mxu1 }
 0x162   : > { %925 = vst [vmem:[#allocation2 + $0xe0] sm:$0xff] %v871_v3  ;;  %v744_v29 = vadd.f32 %v2242_v44, %v743_v7  ;;  %v1304_v17 = vadd.f32 %v1296_v5, %v1267_v4  ;;  %v1333_v18 = vmul.f32 %v2340_v24, %v1316_v8  ;;  %v1094_v25 = vld [vmem:[#allocation2 + $0xc2] ss:$2 sm:$0xff]  ;;  %v1232_v44 = vadd.f32 %v1224_v14, %v1195_v11  ;;  %v1281_v11 = vld [vmem:[#allocation2 + $0xf1] ss:$2 sm:$0xff] }
 0x163   : > { %v1840_v22 = vpop.f32.mrf.mxu0  ;;  %v1110_v38 = vmul.f32 %v2286_v0, %v1094_v25  ;;  %v1243_v3 = vld [vmem:[#allocation2 + $0xf0] ss:$2 sm:$0xff]  ;;  %v1308_v5 = vadd.f32 %v1300_v55, %v1271_v53  ;;  %v1337_v7 = vmul.f32 %v2340_v24, %v1324_v60 }
 0x164   : > { %v872_v27 = vmax.f32 %v744_v29, 0.0  ;;  %v1341_v28 = vadd.f32 %v1333_v18, %v1304_v17  ;;  %v1270_v50 = vadd.f32 %v1262_v35, %v1232_v44  ;;  %v1260_v14 = vmul.f32 %v2320_v51, %v1243_v3  ;;  %v1887_v44 = vpop.f32.mrf.mxu1  ;;  %v1706_v35 = vld [vmem:[%s2467_s6] ss:$0 sm:$0xff] }
 0x165   : > { %v1118_v0 = vadd.f32 %v1110_v38, %v1081_v52  ;;  %v1345_v29 = vadd.f32 %v1337_v7, %v1308_v5  ;;  %v1297_v18 = vmul.f32 %v2334_v15, %v1281_v11 }
 0x166   : > { %926 = vst [vmem:[#allocation2 + $0xe8] sm:$0xff] %v872_v27  ;;  %v1356_v37 = vadd.f32 %v2356_v62, %v1341_v28  ;;  %v1307_v4 = vadd.f32 %v1299_v54, %v1270_v50  ;;  %v839_v24 = vpop.f32.mrf.mxu1 }
 0x168   : > { %v1364_v45 = vmax.f32 %v1356_v37, 0.0  ;;  %v1888_v34 = vpop.f32.mrf.mxu1 }
 0x169   : > { %v1131_v48 = vld [vmem:[#allocation2 + $0xd8] ss:$2 sm:$0xff]  ;;  %v1169_v49 = vld [vmem:[#allocation2 + $0xd9] ss:$2 sm:$0xff] }
 0x16a   : > { %v1370_v56 = vpack.c.bf16 %v1364_v45, %v1363_v47  ;;  %v1148_v57 = vmul.f32 %v2294_v13, %v1131_v48  ;;  %v1185_v63 = vmul.f32 %v2304_v31, %v1169_v49  ;;  %v1306_v13 = vadd.f32 %v1298_v46, %v1269_v58 }
 0x16b   : > { %v1344_v31 = vadd.f32 %v1336_v6, %v1307_v4 }
 0x16c   : > { %1906 = vmatmul.mubr.bf16.vlgmr.msra.gmra.mxu1 %v1370_v56  ;;  %v1156_v1 = vadd.f32 %v1148_v57, %v1118_v0  ;;  %v1343_v19 = vadd.f32 %v1335_v10, %v1306_v13 }
 0x16d   : > { %v1206_v2 = vld [vmem:[#allocation2 + $0xda] ss:$2 sm:$0xff]  ;;  %v1359_v22 = vadd.f32 %v2356_v62, %v1344_v31 }
 0x16e   : > { %v1193_v8 = vadd.f32 %v1185_v63, %v1156_v1  ;;  %v1222_v9 = vmul.f32 %v2313_v41, %v1206_v2  ;;  %v1360_v41 = vadd.f32 %v2356_v62, %v1345_v29  ;;  %v1358_v25 = vadd.f32 %v2356_v62, %v1343_v19 }
 0x16f   : > { %v1367_v26 = vmax.f32 %v1359_v22, 0.0 }
 0x170   : > { %v1230_v12 = vadd.f32 %v1222_v9, %v1193_v8  ;;  %v1368_v27 = vmax.f32 %v1360_v41, 0.0  ;;  %v1366_v30 = vmax.f32 %v1358_v25, 0.0 }
 0x172   : > { %v1268_v17 = vadd.f32 %v1260_v14, %v1230_v12  ;;  %v1372_v33 = vpack.c.bf16 %v1368_v27, %v1367_v26 }
 0x174   : > { %v1305_v20 = vadd.f32 %v1297_v18, %v1268_v17 }
 0x176   : > { %v1342_v23 = vadd.f32 %v1334_v21, %v1305_v20 }
 0x178   : > { %v1357_v51 = vadd.f32 %v2356_v62, %v1342_v23 }
 0x17a   : > { %v1365_v28 = vmax.f32 %v1357_v51, 0.0 }
 0x17c   : > { %v1371_v15 = vpack.c.bf16 %v1366_v30, %v1365_v28 }
 0x17e   : > { %1909 = vmatprep.mubr.bf16.mxu1 %v1371_v15 }
 0x17f   : > { %1910 = vmatmul.mubr.bf16.gmra.mxu1 %v1372_v33 }
 0x22c   : > { %v1907_v62 = vpop.f32.mrf.mxu1 }
 0x22d   : > { %v1487_v36 = vadd.f32 %v1907_v62, %v1706_v35 }
 0x22e   : > { %v1478_v37 = vpop.f32.mrf.mxu1 }
 0x22f   : > { %1511 = vst [vmem:[%s300_s11 + $0x10] sm:$0xff] %v1487_v36  ;;  %v1479_v38 = vadd.f32 %v1706_v35, %v1478_v37 }
 0x230   : > { %v1908_v39 = vpop.f32.mrf.mxu1 }
 0x231   : > { %1509 = vst [vmem:[%s300_s11] sm:$0xff] %v1479_v38  ;;  %v1490_v40 = vadd.f32 %v1908_v39, %v1706_v35 }
 0x232   : > { %v1481_v42 = vpop.f32.mrf.mxu1 }
 0x233   : > { %1512 = vst [vmem:[%s300_s11 + $0x18] sm:$0xff] %v1490_v40  ;;  %v1482_v43 = vadd.f32 %v1706_v35, %v1481_v42 }
 0x235   : > { %1510 = vst [vmem:[%s300_s11 + $0x8] sm:$0xff] %v1482_v43 }
 0x23f   : > { %v1911_v47 = vpop.f32.mrf.mxu1 }
 0x240   : > { %v1503_v45 = vadd.f32 %v1911_v47, %v1706_v35 }
 0x241   : > { %v1494_v52 = vpop.f32.mrf.mxu1 }
 0x242   : > { %1515 = vst [vmem:[%s300_s11 + $0x30] sm:$0xff] %v1503_v45  ;;  %v1495_v46 = vadd.f32 %v1706_v35, %v1494_v52 }
 0x243   : > { %v1912_v48 = vpop.f32.mrf.mxu1 }
 0x244   : > { %1513 = vst [vmem:[%s300_s11 + $0x20] sm:$0xff] %v1495_v46  ;;  %v1506_v49 = vadd.f32 %v1912_v48, %v1706_v35 }
 0x245   : > { %v1497_v50 = vpop.f32.mrf.mxu1 }
 0x246   : > { %1516 = vst [vmem:[%s300_s11 + $0x38] sm:$0xff] %v1506_v49  ;;  %v1498_v53 = vadd.f32 %v1706_v35, %v1497_v50 }
 0x248   : > { %1514 = vst [vmem:[%s300_s11 + $0x28] sm:$0xff] %v1498_v53 }
 0x249 PF: > { %s17_s26 = sadd.s32 1, %s2023_s26   ;;  %s2469_s24 = smov %s2019_s25 }
 0x24a   : > { %p14_p5 = scmp.ge.s32.totalorder %s17_s26, 4   ;;  %s2470_s25 = smov %s2472_s27 }
 0x24c   :  { %16 = sbr.rel (!%p14_p5) target bundleno = 2 (0x2), region = 166 }

</bundles_post_ra>
